<compile_context>
chip_gen: v6e
topology: v6e:2x2x1
jax: 0.10.0
libtpu: 0.0.40
codegen_flags: <defaults>
</compile_context>

<pallas_src>
import jax
import jax.numpy as jnp
from jax import lax
from jax.experimental import pallas as pl
from jax.experimental.pallas import tpu as pltpu

# ---- module hyper-parameters (defaults of EnvMapField.__init__) -------------
NUM_LEVELS = 16
FEATURES_PER_LEVEL = 2
LOG2_HASHMAP_SIZE = 16
BASE_RESOLUTION = 16
PER_LEVEL_SCALE = 1.5          # growth factor between grid levels
APP_EMB_DIM = 32               # appearance_embedding_dim
HIDDEN_DIM = 64                # n_neurons
FEATURE_DIM = 64               # feature_dim
ENC_DIM = NUM_LEVELS * FEATURES_PER_LEVEL        # 32
HEAD_IN_DIM = ENC_DIM + APP_EMB_DIM              # 64
OUT_LANES = 128                # packed output: [rgb(3) | pad(61) | feat(64)]
FEAT_LANE_OFFSET = 64

TM = 512                       # points per grid step (sweep 512-2048)


# ---------------------------------------------------------------------------
# Pallas kernel: both MLP heads fused into two block-diagonal matmuls.
# ---------------------------------------------------------------------------
def _envmap_heads_kernel(x_ref, w_ref, out_ref):
    # x_ref : (TM, 64)  bf16  = [hash embedding | appearance embedding]
    # w_ref : (192, 128) bf16 = [W1 (64,128) ; W2 (128,128)] stacked on rows
    # out_ref: (TM, 128) f32  lane-dense output slab
    x = x_ref[...]                                   # (TM, 64) bf16
    w = w_ref[...]                                   # (192, 128) bf16
    w1 = w[:HEAD_IN_DIM, :]                          # (64, 128)
    w2 = w[HEAD_IN_DIM:, :]                          # (128, 128)

    # Layer 1 (both heads at once): [h_rgb_pre | h_feat_pre]
    h = jnp.dot(x, w1, preferred_element_type=jnp.float32)        # (TM, 128) f32
    h = jnp.maximum(h, 0.0)                                       # ReLU

    # Layer 2 (both heads at once): [rgb_pre(3)+pad | feat_pre(64)]
    pre = jnp.dot(h.astype(jnp.bfloat16), w2,
                  preferred_element_type=jnp.float32)             # (TM, 128) f32

    # Per-lane output activation + scaling (cheap VPU/EUP filler, done in f32):
    #   lanes <  64 : sigmoid(pre) * 1.002 - 0.001   (RGB head)
    #   lanes >= 64 : tanh(pre)    * 1.1             (feature head)
    lane = lax.broadcasted_iota(jnp.int32, pre.shape, 1)
    rgb_act = jax.nn.sigmoid(pre) * (1.0 + 0.002) - 0.001
    feat_act = jnp.tanh(pre) * 1.1
    out_ref[...] = jnp.where(lane < FEAT_LANE_OFFSET,
                             rgb_act, feat_act).astype(out_ref.dtype)


def envmap_heads(embedding, appearance_embedding, packed_w):
    """Run the fused RGB / feature MLP heads.

    embedding: (N, 32) f32, appearance_embedding: (N, 32) f32,
    packed_w: (192, 128) bf16. Returns (rgb (N,3), features (N,64)), f32.
    """
    n = embedding.shape[0]
    # Concatenate once in the wrapper; MXU operands in bf16, f32 accumulation.
    x = jnp.concatenate([embedding, appearance_embedding],
                        axis=-1).astype(jnp.bfloat16)             # (N, 64)

    n_steps = pl.cdiv(n, TM)
    n_pad = n_steps * TM
    if n_pad != n:                                                # tail padding
        x = jnp.pad(x, ((0, n_pad - n), (0, 0)))

    out = pl.pallas_call(
        _envmap_heads_kernel,
        out_shape=jax.ShapeDtypeStruct((n_pad, OUT_LANES), jnp.float32),
        grid=(n_steps,),
        in_specs=[
            pl.BlockSpec((TM, HEAD_IN_DIM), lambda i: (i, 0)),        # x tile
            pl.BlockSpec((HEAD_IN_DIM + OUT_LANES, OUT_LANES),
                         lambda i: (0, 0)),                           # weights (resident)
        ],
        out_specs=pl.BlockSpec((TM, OUT_LANES), lambda i: (i, 0)),
        compiler_params=pltpu.CompilerParams(
            dimension_semantics=("parallel",)),
    )(x, packed_w)

    rgb = out[:n, :3]
    features = out[:n, FEAT_LANE_OFFSET:FEAT_LANE_OFFSET + FEATURE_DIM]
    return rgb, features


# ---------------------------------------------------------------------------
# Weight packing: 5 head weights -> one (192, 128) bf16 array, done once.
# ---------------------------------------------------------------------------
def pack_head_weights(wh1e, wh1a, wh2, wf1, wf2):
    zeros = lambda r, c: jnp.zeros((r, c), jnp.float32)
    # W1 = [[wh1e, wf1], [wh1a, 0]]                                (64, 128)
    w1 = jnp.concatenate([
        jnp.concatenate([wh1e, wf1], axis=1),                      # (32, 128)
        jnp.concatenate([wh1a, zeros(APP_EMB_DIM, HIDDEN_DIM)], axis=1),
    ], axis=0)
    # W2 = blockdiag(pad(wh2 -> 64x64), wf2)                       (128, 128)
    wh2_pad = jnp.pad(wh2, ((0, 0), (0, FEAT_LANE_OFFSET - wh2.shape[1])))
    w2 = jnp.concatenate([
        jnp.concatenate([wh2_pad, zeros(HIDDEN_DIM, FEATURE_DIM)], axis=1),
        jnp.concatenate([zeros(HIDDEN_DIM, FEAT_LANE_OFFSET), wf2], axis=1),
    ], axis=0)
    return jnp.concatenate([w1, w2], axis=0).astype(jnp.bfloat16)  # (192, 128)


# ---------------------------------------------------------------------------
# Hash-grid encoding (plain-JAX glue; stand-in for tcnn SequentialGrid).
# Restructured to a single flattened gather instead of 256 small ones.
# ---------------------------------------------------------------------------
def hash_grid_encode(xyzt, table):
    """xyzt: (N,4) f32; table: (NUM_LEVELS, 2**LOG2, F) f32 -> (N, 32) f32."""
    n = xyzt.shape[0]
    t_size = 1 << LOG2_HASHMAP_SIZE
    primes = jnp.array([1, 2654435761, 805459861, 3674653429], dtype=jnp.uint32)
    mask = jnp.uint32(t_size - 1)

    res = jnp.floor(BASE_RESOLUTION *
                    PER_LEVEL_SCALE ** jnp.arange(NUM_LEVELS, dtype=jnp.float32))
    pos = xyzt[:, None, :] * res[None, :, None]                   # (N, L, 4)
    pos0f = jnp.floor(pos)
    frac = pos - pos0f                                            # (N, L, 4)
    pos0 = pos0f.astype(jnp.int32).astype(jnp.uint32)             # (N, L, 4)

    # 16 corner offsets of the 4-D hypercube.
    corner_ids = jnp.arange(16, dtype=jnp.uint32)
    offs = (corner_ids[:, None] >> jnp.arange(4, dtype=jnp.uint32)[None, :]) & 1  # (16,4)

    idx = pos0[:, :, None, :] + offs[None, None, :, :]            # (N, L, 16, 4)
    h = idx * primes[None, None, None, :]
    h = (h[..., 0] ^ h[..., 1] ^ h[..., 2] ^ h[..., 3]) & mask    # (N, L, 16)

    # quadrilinear interpolation weights
    w = jnp.prod(jnp.where(offs[None, None, :, :] == 1,
                           frac[:, :, None, :], 1.0 - frac[:, :, None, :]),
                 axis=-1)                                         # (N, L, 16)

    # one flattened gather for all levels x corners
    lvl_off = (jnp.arange(NUM_LEVELS, dtype=jnp.uint32)
               * jnp.uint32(t_size))[None, :, None]
    flat_idx = (h + lvl_off).astype(jnp.int32)                    # (N, L, 16)
    flat_table = table.reshape(NUM_LEVELS * t_size, FEATURES_PER_LEVEL)
    gathered = jnp.take(flat_table, flat_idx, axis=0)             # (N, L, 16, F)
    feats = jnp.sum(w[..., None] * gathered, axis=2)              # (N, L, F)
    return feats.reshape(n, NUM_LEVELS * FEATURES_PER_LEVEL)      # (N, 32)


# ---------------------------------------------------------------------------
# Parameter construction (deterministic, synthetic).
# ---------------------------------------------------------------------------
def init_params(key):
    k = jax.random.split(key, 6)

    def w(rng, fan_in, fan_out):
        return (jax.random.normal(rng, (fan_in, fan_out), jnp.float32)
                * jnp.sqrt(2.0 / fan_in))

    wh1e = w(k[0], ENC_DIM, HIDDEN_DIM)          # mlp_head L1, embedding half
    wh1a = w(k[1], APP_EMB_DIM, HIDDEN_DIM)      # mlp_head L1, appearance half
    wh2 = w(k[2], HIDDEN_DIM, 3)                 # mlp_head L2
    wf1 = w(k[3], ENC_DIM, HIDDEN_DIM)           # mlp_feature L1
    wf2 = w(k[4], HIDDEN_DIM, FEATURE_DIM)       # mlp_feature L2
    return {
        "packed_w": pack_head_weights(wh1e, wh1a, wh2, wf1, wf2),  # (192,128) bf16
        "table": jax.random.uniform(
            k[5], (NUM_LEVELS, 1 << LOG2_HASHMAP_SIZE, FEATURES_PER_LEVEL),
            jnp.float32, minval=-1e-4, maxval=1e-4),
    }


@jax.jit
def env_map_field_forward(directions, video_ids, appearance_embedding, params):
    """EnvMapField.forward with output_type=None, filter_features=False."""
    xyzt = jnp.concatenate([directions, video_ids], axis=-1)      # (N, 4)
    embedding = hash_grid_encode(xyzt, params["table"])           # (N, 32)
    rgb, features = envmap_heads(embedding, appearance_embedding,
                                 params["packed_w"])
    return {"rgb": rgb, "features": features}


if __name__ == "__main__":
    key = jax.random.PRNGKey(0)
    kp, kd, kv, ka = jax.random.split(key, 4)

    # Deliberately NOT a multiple of TM: exercises the cdiv grid + tail padding.
    N = 1000
    params = init_params(kp)

    d = jax.random.normal(kd, (N, 3), jnp.float32)
    directions = d / (jnp.linalg.norm(d, axis=-1, keepdims=True) + 1e-8)
    video_ids = jax.random.randint(kv, (N, 1), 0, 4).astype(jnp.float32)
    appearance_embedding = jax.random.normal(ka, (N, APP_EMB_DIM), jnp.float32)

    out = env_map_field_forward(directions, video_ids, appearance_embedding, params)
    jax.block_until_ready(out)

    assert out["rgb"].shape == (N, 3)
    assert out["features"].shape == (N, FEATURE_DIM)
    assert jnp.all(jnp.isfinite(out["rgb"]))
    assert jnp.all(jnp.isfinite(out["features"]))
    # Range sanity: sigmoid*1.002-0.001 in (-0.001, 1.001); tanh*1.1 in [-1.1, 1.1]
    assert jnp.all(out["rgb"] > -0.0011) and jnp.all(out["rgb"] < 1.0011)
    assert jnp.all(jnp.abs(out["features"]) <= 1.1001)
    print("KERNEL_OK")
</pallas_src>

<mosaic_0001>
module attributes {stable_mosaic.version = 11 : i64} {
  func.func @_envmap_heads_kernel(%arg0: i32, %arg1: memref<512x64xbf16, #tpu.memory_space<vmem>>, %arg2: memref<192x128xbf16, #tpu.memory_space<vmem>>, %arg3: memref<512x128xf32, #tpu.memory_space<vmem>>) attributes {dimension_semantics = [#tpu.dimension_semantics<parallel>], iteration_bounds = array<i64: 2>, scalar_prefetch = 0 : i64, scratch_operands = 0 : i64, tpu.core_type = #tpu.core_type<tc>, window_params = [{transform_indices = @transform_0, window_bounds = array<i64: 512, 64>}, {pipeline_mode = #tpu.pipeline_mode<synchronous>, transform_indices = @transform_1, window_bounds = array<i64: 192, 128>}, {transform_indices = @transform_2, window_bounds = array<i64: 512, 128>}]} {
    %c0 = arith.constant 0 : index
    %c0_0 = arith.constant 0 : index
    %0 = vector.load %arg1[%c0, %c0_0] : memref<512x64xbf16, #tpu.memory_space<vmem>>, vector<512x64xbf16>
    %c0_1 = arith.constant 0 : index
    %c0_2 = arith.constant 0 : index
    %1 = vector.load %arg2[%c0_1, %c0_2] : memref<192x128xbf16, #tpu.memory_space<vmem>>, vector<192x128xbf16>
    %2 = vector.extract_strided_slice %1 {offsets = [0, 0], sizes = [64, 128], strides = [1, 1]} : vector<192x128xbf16> to vector<64x128xbf16>
    %3 = vector.extract_strided_slice %1 {offsets = [64, 0], sizes = [128, 128], strides = [1, 1]} : vector<192x128xbf16> to vector<128x128xbf16>
    %cst = arith.constant dense<0.000000e+00> : vector<512x128xf32>
    %4 = tpu.matmul %0, %2, %cst {dimension_numbers = #tpu.dot_dimension_numbers<[1], [0], [0], [1], [0, 0, 1, 1], [], []>} : vector<512x64xbf16>, vector<64x128xbf16>, vector<512x128xf32> -> vector<512x128xf32>
    %cst_3 = arith.constant 0.000000e+00 : f32
    %5 = vector.broadcast %cst_3 : f32 to vector<512x128xf32>
    %6 = arith.maximumf %4, %5 : vector<512x128xf32>
    %7 = arith.truncf %6 : vector<512x128xf32> to vector<512x128xbf16>
    %cst_4 = arith.constant dense<0.000000e+00> : vector<512x128xf32>
    %8 = tpu.matmul %7, %3, %cst_4 {dimension_numbers = #tpu.dot_dimension_numbers<[1], [0], [0], [1], [0, 0, 1, 1], [], []>} : vector<512x128xbf16>, vector<128x128xbf16>, vector<512x128xf32> -> vector<512x128xf32>
    %9 = tpu.iota {dimensions = array<i32: 1>} : vector<512x128xi32>
    %10 = arith.negf %8 : vector<512x128xf32>
    %11 = math.exp %10 : vector<512x128xf32>
    %cst_5 = arith.constant 1.000000e+00 : f32
    %12 = vector.broadcast %cst_5 : f32 to vector<512x128xf32>
    %13 = arith.addf %12, %11 : vector<512x128xf32>
    %14 = arith.divf %12, %13 : vector<512x128xf32>
    %cst_6 = arith.constant 1.002000e+00 : f32
    %15 = vector.broadcast %cst_6 : f32 to vector<512x128xf32>
    %16 = arith.mulf %14, %15 : vector<512x128xf32>
    %cst_7 = arith.constant 1.000000e-03 : f32
    %17 = vector.broadcast %cst_7 : f32 to vector<512x128xf32>
    %18 = arith.subf %16, %17 : vector<512x128xf32>
    %19 = math.tanh %8 : vector<512x128xf32>
    %cst_8 = arith.constant 1.100000e+00 : f32
    %20 = vector.broadcast %cst_8 : f32 to vector<512x128xf32>
    %21 = arith.mulf %19, %20 : vector<512x128xf32>
    %c64_i32 = arith.constant 64 : i32
    %22 = vector.broadcast %c64_i32 : i32 to vector<512x128xi32>
    %23 = arith.cmpi slt, %9, %22 : vector<512x128xi32>
    %24 = arith.select %23, %18, %21 : vector<512x128xi1>, vector<512x128xf32>
    %c0_9 = arith.constant 0 : index
    %c0_10 = arith.constant 0 : index
    %25 = vector.load %arg3[%c0_9, %c0_10] : memref<512x128xf32, #tpu.memory_space<vmem>>, vector<512x128xf32>
    tpu.vector_store %arg3[%c0_9, %c0_10], %24 {strides = array<i32>} : memref<512x128xf32, #tpu.memory_space<vmem>>, vector<512x128xf32>,
    return
  }
  func.func @transform_0(%arg0: i32) -> (i32, i32) {
    %c0_i32 = arith.constant 0 : i32
    %c0_i32_0 = arith.constant 0 : i32
    return %arg0, %c0_i32 : i32, i32
  }
  func.func @transform_1(%arg0: i32) -> (i32, i32) {
    %c0_i32 = arith.constant 0 : i32
    %c0_i32_0 = arith.constant 0 : i32
    %c0_i32_1 = arith.constant 0 : i32
    return %c0_i32, %c0_i32_0 : i32, i32
  }
  func.func @transform_2(%arg0: i32) -> (i32, i32) {
    %c0_i32 = arith.constant 0 : i32
    %c0_i32_0 = arith.constant 0 : i32
    return %arg0, %c0_i32 : i32, i32
  }
}

</mosaic_0001>

<bundles_post_ra>
// kernel: env_map_field_forward.1
= control target key start
LH: loop header
LB: loop body
LE: loop exit
PB: predicated region body
PF: predicated region fallthrough
CT: control target
= control target key end

     0   :  { %s2984_s9 = smov 0   ;;  %s3531_s0 = inlined_call_operand.vmem [shape: bf16[1024,64], index: 0, kind: input, shape index: {}]   ;;  %s3532_s1 = inlined_call_operand.vmem [shape: bf16[192,128], index: 1, kind: input, shape index: {}]   ;;  %s3533_s2 = inlined_call_operand.vmem [shape: f32[1024,128], index: 2, kind: output, shape index: {}]  }
   0x1 LB: > { %s2066_s10 = sadd.s32 4294967295, %s2967_s9   ;;  %p2070_p0 = scmp.ge.s32.totalorder %s2967_s9, 1  ;;  %s2967_s9 = sphi %s2984_s9, %s12_s9  }
   0x2   : > { %p113_p1 = scmp.lt.s32.totalorder %s2967_s9, 3 }
   0x4   : > { %p114_p2 = pnand %p2070_p0, %p113_p1 }
   0x5   : > { %s2071_s13 = sshll.u32 (!%p114_p2), %s2066_s10, 6 }
   0x6   : > { %117 = sbr.rel (%p114_p2) target bundleno = 646 (0x286), region = 28  ;;  %p136_p3 = scmp.lt.s32.totalorder (!%p114_p2), %s2071_s13, 127 }
   0xb   : > { %v2533_v0 = vld [vmem:[%s3532_s1 + $0x18] sm:$0xff]   ;;  %v2534_v1 = vld [vmem:[%s3532_s1 + $0x10] sm:$0xff]   ;;  %v2535_v2 = vld [vmem:[%s3532_s1 + $0x8] sm:$0xff]   ;;  %s3535_s13 = smov (!%p136_p3, %s2071_s13), 127  ;;  %vm420_vm0 = vcmask 523264  }
   0xc   : > { %2357 = vmatprep.subr.bf16.mxu0 %v2533_v0  ;;  %s2072_s18 = sshll.u32 %s3535_s13, 2  ;;  %v2536_v4 = vld [vmem:[%s3532_s1] sm:$0xff]   ;;  %v2569_v13 = vld [vmem:[%s3532_s1 + $0x58] sm:$0xff]   ;;  %v2570_v14 = vld [vmem:[%s3532_s1 + $0x50] sm:$0xff]   ;;  %s2074_s14 = sshll.u32 %s3535_s13, 3 }
   0xd   : > { %2358 = vmatpush3.bf16.msra.mxu0 %v2533_v0  ;;  %s3007_s21 = scalar_lea.vmem %s3531_s0, %s2072_s18  ;;  %2509 = vmatprep.subr.bf16.mxu1 %v2569_v13  ;;  %v2571_v15 = vld [vmem:[%s3532_s1 + $0x48] sm:$0xff]   ;;  %v2572_v18 = vld [vmem:[%s3532_s1 + $0x40] sm:$0xff]   ;;  %v2573_v19 = vld [vmem:[%s3532_s1 + $0x38] sm:$0xff]   ;;  %s3132_s13 = scalar_lea.vmem %s3533_s2, %s2074_s14 }
   0xe   : > { %2359 = vmatprep.subr.bf16.mxu0 %v2534_v1  ;;  %v2537_v3 = vld [vmem:[%s3007_s21] sm:$0xff]   ;;  %v2538_v5 = vld [vmem:[%s3007_s21 + $0x8] sm:$0xff]   ;;  %v2539_v6 = vld [vmem:[%s3007_s21 + $0x10] sm:$0xff]   ;;  %2517 = vmatpush3.bf16.msra.mxu1 %v2569_v13 }
   0xf   : > { %2365 = vmatprep.mubr.msk.bf16.mxu0 %vm420_vm0, %v2537_v3  ;;  %v2540_v7 = vld [vmem:[%s3007_s21 + $0x18] sm:$0xff]   ;;  %v2541_v8 = vld [vmem:[%s3007_s21 + $0x20] sm:$0xff]   ;;  %v2542_v9 = vld [vmem:[%s3007_s21 + $0x28] sm:$0xff]   ;;  %2510 = vmatprep.subr.bf16.mxu1 %v2570_v14 }
  0x10   : > { %v2543_v10 = vld [vmem:[%s3007_s21 + $0x30] sm:$0xff]   ;;  %v2544_v11 = vld [vmem:[%s3007_s21 + $0x38] sm:$0xff]   ;;  %v2545_v12 = vld [vmem:[%s3007_s21 + $0x40] sm:$0xff]  }
  0x11   : > { %2360 = vmatpush3.bf16.msra.mxu0 %v2534_v1  ;;  %v2546_v16 = vld [vmem:[%s3007_s21 + $0x48] sm:$0xff]   ;;  %v2547_v17 = vld [vmem:[%s3007_s21 + $0x50] sm:$0xff]   ;;  %v2548_v20 = vld [vmem:[%s3007_s21 + $0x58] sm:$0xff]  }
  0x12   : > { %2361 = vmatprep.subr.bf16.mxu0 %v2535_v2  ;;  %2518 = vmatpush3.bf16.msra.mxu1 %v2570_v14  ;;  %v2549_v21 = vld [vmem:[%s3007_s21 + $0x60] sm:$0xff]   ;;  %v2550_v22 = vld [vmem:[%s3007_s21 + $0x68] sm:$0xff]   ;;  %v2551_v23 = vld [vmem:[%s3007_s21 + $0x70] sm:$0xff]  }
  0x13   : > { %2511 = vmatprep.subr.bf16.mxu1 %v2571_v15  ;;  %v2552_v24 = vld [vmem:[%s3007_s21 + $0x78] sm:$0xff]   ;;  %v2553_v25 = vld [vmem:[%s3007_s21 + $0x80] sm:$0xff]   ;;  %v2554_v26 = vld [vmem:[%s3007_s21 + $0x88] sm:$0xff]  }
  0x14   : > { %v2555_v27 = vld [vmem:[%s3007_s21 + $0x90] sm:$0xff]   ;;  %v2575_v29 = vld [vmem:[%s3532_s1 + $0x28] sm:$0xff]   ;;  %v2556_v30 = vld [vmem:[%s3007_s21 + $0x98] sm:$0xff]  }
  0x15   : > { %2362 = vmatpush3.bf16.msra.mxu0 %v2535_v2  ;;  %v2574_v28 = vld [vmem:[%s3532_s1 + $0x30] sm:$0xff]   ;;  %v2557_v31 = vld [vmem:[%s3007_s21 + $0xa0] sm:$0xff]   ;;  %v2558_v33 = vld [vmem:[%s3007_s21 + $0xa8] sm:$0xff]  }
  0x16   : > { %2363 = vmatprep.subr.bf16.mxu0 %v2536_v4  ;;  %2519 = vmatpush3.bf16.msra.mxu1 %v2571_v15  ;;  %v2576_v32 = vld [vmem:[%s3532_s1 + $0x20] sm:$0xff]   ;;  %v2559_v34 = vld [vmem:[%s3007_s21 + $0xb0] sm:$0xff]   ;;  %v2560_v35 = vld [vmem:[%s3007_s21 + $0xb8] sm:$0xff]  }
  0x17   : > { %2512 = vmatprep.subr.bf16.mxu1 %v2572_v18  ;;  %v2561_v36 = vld [vmem:[%s3007_s21 + $0xc0] sm:$0xff]   ;;  %v2562_v37 = vld [vmem:[%s3007_s21 + $0xc8] sm:$0xff]   ;;  %v2563_v38 = vld [vmem:[%s3007_s21 + $0xd0] sm:$0xff]  }
  0x18   : > { %v2564_v39 = vld [vmem:[%s3007_s21 + $0xd8] sm:$0xff]   ;;  %v2565_v40 = vld [vmem:[%s3007_s21 + $0xe0] sm:$0xff]   ;;  %v2566_v41 = vld [vmem:[%s3007_s21 + $0xe8] sm:$0xff]  }
  0x19   : > { %2364 = vmatpush3.bf16.msra.mxu0 %v2536_v4  ;;  %v2567_v42 = vld [vmem:[%s3007_s21 + $0xf0] sm:$0xff]   ;;  %v2568_v43 = vld [vmem:[%s3007_s21 + $0xf8] sm:$0xff]  }
  0x1a   : > { %2429 = vmatprep.subr.bf16.mxu0 %v2569_v13  ;;  %2520 = vmatpush3.bf16.msra.mxu1 %v2572_v18 }
  0x1b   : > { %2513 = vmatprep.subr.bf16.mxu1 %v2573_v19 }
  0x1c   : > { %2366 = vmatmul.mubr.msk.bf16.vlgmr.msra.gmra.mxu0 %vm420_vm0, %v2538_v5 }
  0x1d   : > { %2369 = vmatprep.mubr.msk.bf16.mxu0 %vm420_vm0, %v2539_v6  ;;  %2430 = vmatpush3.bf16.msra.mxu0 %v2569_v13 }
  0x1e   : > { %2431 = vmatprep.subr.bf16.mxu0 %v2570_v14  ;;  %2521 = vmatpush3.bf16.msra.mxu1 %v2573_v19 }
  0x1f   : > { %2514 = vmatprep.subr.bf16.mxu1 %v2574_v28 }
  0x21   : > { %2432 = vmatpush3.bf16.msra.mxu0 %v2570_v14 }
  0x22   : > { %2433 = vmatprep.subr.bf16.mxu0 %v2571_v15  ;;  %2522 = vmatpush3.bf16.msra.mxu1 %v2574_v28 }
  0x23   : > { %2515 = vmatprep.subr.bf16.mxu1 %v2575_v29 }
  0x24   : > { %2370 = vmatmul.mubr.msk.bf16.gmra.mxu0 %vm420_vm0, %v2540_v7 }
  0x25   : > { %2373 = vmatprep.mubr.msk.bf16.mxu0 %vm420_vm0, %v2541_v8  ;;  %2434 = vmatpush3.bf16.msra.mxu0 %v2571_v15 }
  0x26   : > { %2435 = vmatprep.subr.bf16.mxu0 %v2572_v18  ;;  %2523 = vmatpush3.bf16.msra.mxu1 %v2575_v29 }
  0x27   : > { %2516 = vmatprep.subr.bf16.mxu1 %v2576_v32 }
  0x29   : > { %2436 = vmatpush3.bf16.msra.mxu0 %v2572_v18 }
  0x2a   : > { %2437 = vmatprep.subr.bf16.mxu0 %v2573_v19  ;;  %2524 = vmatpush3.bf16.msra.mxu1 %v2576_v32 }
  0x2c   : > { %2374 = vmatmul.mubr.msk.bf16.gmra.mxu0 %vm420_vm0, %v2542_v9 }
  0x2d   : > { %2377 = vmatprep.mubr.msk.bf16.mxu0 %vm420_vm0, %v2543_v10  ;;  %2438 = vmatpush3.bf16.msra.mxu0 %v2573_v19 }
  0x2e   : > { %2439 = vmatprep.subr.bf16.mxu0 %v2574_v28 }
  0x31   : > { %2440 = vmatpush3.bf16.msra.mxu0 %v2574_v28 }
  0x32   : > { %2441 = vmatprep.subr.bf16.mxu0 %v2575_v29 }
  0x34   : > { %2378 = vmatmul.mubr.msk.bf16.gmra.mxu0 %vm420_vm0, %v2544_v11 }
  0x35   : > { %2381 = vmatprep.mubr.msk.bf16.mxu0 %vm420_vm0, %v2545_v12  ;;  %2442 = vmatpush3.bf16.msra.mxu0 %v2575_v29 }
  0x36   : > { %2443 = vmatprep.subr.bf16.mxu0 %v2576_v32 }
  0x39   : > { %2444 = vmatpush3.bf16.msra.mxu0 %v2576_v32 }
  0x3c   : > { %2382 = vmatmul.mubr.msk.bf16.gmra.mxu0 %vm420_vm0, %v2546_v16 }
  0x3d   : > { %2385 = vmatprep.mubr.msk.bf16.mxu0 %vm420_vm0, %v2547_v17 }
  0x44   : > { %2386 = vmatmul.mubr.msk.bf16.gmra.mxu0 %vm420_vm0, %v2548_v20 }
  0x45   : > { %2389 = vmatprep.mubr.msk.bf16.mxu0 %vm420_vm0, %v2549_v21 }
  0x4c   : > { %2390 = vmatmul.mubr.msk.bf16.gmra.mxu0 %vm420_vm0, %v2550_v22 }
  0x4d   : > { %2393 = vmatprep.mubr.msk.bf16.mxu0 %vm420_vm0, %v2551_v23 }
  0x54   : > { %2394 = vmatmul.mubr.msk.bf16.gmra.mxu0 %vm420_vm0, %v2552_v24 }
  0x55   : > { %2397 = vmatprep.mubr.msk.bf16.mxu0 %vm420_vm0, %v2553_v25 }
  0x5c   : > { %2398 = vmatmul.mubr.msk.bf16.gmra.mxu0 %vm420_vm0, %v2554_v26 }
  0x5d   : > { %2401 = vmatprep.mubr.msk.bf16.mxu0 %vm420_vm0, %v2555_v27 }
  0x64   : > { %2402 = vmatmul.mubr.msk.bf16.gmra.mxu0 %vm420_vm0, %v2556_v30 }
  0x65   : > { %2405 = vmatprep.mubr.msk.bf16.mxu0 %vm420_vm0, %v2557_v31 }
  0x6c   : > { %2406 = vmatmul.mubr.msk.bf16.gmra.mxu0 %vm420_vm0, %v2558_v33 }
  0x6d   : > { %2409 = vmatprep.mubr.msk.bf16.mxu0 %vm420_vm0, %v2559_v34 }
  0x74   : > { %2410 = vmatmul.mubr.msk.bf16.gmra.mxu0 %vm420_vm0, %v2560_v35 }
  0x75   : > { %2413 = vmatprep.mubr.msk.bf16.mxu0 %vm420_vm0, %v2561_v36 }
  0x7c   : > { %2414 = vmatmul.mubr.msk.bf16.gmra.mxu0 %vm420_vm0, %v2562_v37 }
  0x7d   : > { %2417 = vmatprep.mubr.msk.bf16.mxu0 %vm420_vm0, %v2563_v38 }
  0x84   : > { %2418 = vmatmul.mubr.msk.bf16.gmra.mxu0 %vm420_vm0, %v2564_v39 }
  0x85   : > { %2421 = vmatprep.mubr.msk.bf16.mxu0 %vm420_vm0, %v2565_v40 }
  0x8c   : > { %2422 = vmatmul.mubr.msk.bf16.gmra.mxu0 %vm420_vm0, %v2566_v41 }
  0x8d   : > { %2425 = vmatprep.mubr.msk.bf16.mxu0 %vm420_vm0, %v2567_v42 }
  0x94   : > { %2426 = vmatmul.mubr.msk.bf16.gmra.mxu0 %vm420_vm0, %v2568_v43 }
  0xdc   : > { %v2367_v44 = vpop.f32.mrf.mxu0 }
  0xdd   : > { %v808_v51 = vmax.f32 %v2367_v44, 0.0 }
  0xde   : > { %v551_v45 = vpop.f32.mrf.mxu0 }
  0xdf   : > { %v806_v49 = vmax.f32 %v551_v45, 0.0 }
  0xe0   : > { %v2368_v46 = vpop.f32.mrf.mxu0 }
  0xe1   : > { %v809_v47 = vmax.f32 %v2368_v46, 0.0 }
  0xe2   : > { %v554_v48 = vpop.f32.mrf.mxu0 }
  0xe3   : > { %v807_v50 = vmax.f32 %v554_v48, 0.0  ;;  %v871_v54 = vpack.c.bf16 %v809_v47, %v808_v51 }
  0xe4   : > { %v2371_v52 = vpop.f32.mrf.mxu0 }
  0xe5   : > { %v870_v53 = vpack.c.bf16 %v807_v50, %v806_v49  ;;  %v812_v61 = vmax.f32 %v2371_v52, 0.0 }
  0xe6   : > { %v567_v55 = vpop.f32.mrf.mxu0 }
  0xe7   : > { %2445 = vmatprep.mubr.bf16.mxu0 %v870_v53  ;;  %v810_v59 = vmax.f32 %v567_v55, 0.0 }
  0xe8   : > { %v2372_v56 = vpop.f32.mrf.mxu0  ;;  %2446 = vmatmul.mubr.bf16.vlgmr.msra.gmra.mxu0 %v871_v54 }
  0xe9   : > { %v813_v57 = vmax.f32 %v2372_v56, 0.0 }
  0xea   : > { %v570_v58 = vpop.f32.mrf.mxu0 }
  0xeb   : > { %v811_v60 = vmax.f32 %v570_v58, 0.0  ;;  %v873_v0 = vpack.c.bf16 %v813_v57, %v812_v61 }
  0xec   : > { %v2375_v62 = vpop.f32.mrf.mxu0 }
  0xed   : > { %v872_v63 = vpack.c.bf16 %v811_v60, %v810_v59  ;;  %v816_v7 = vmax.f32 %v2375_v62, 0.0 }
  0xee   : > { %v583_v1 = vpop.f32.mrf.mxu0 }
  0xef   : > { %2449 = vmatprep.mubr.bf16.mxu1 %v872_v63  ;;  %v814_v5 = vmax.f32 %v583_v1, 0.0 }
  0xf0   : > { %v2376_v2 = vpop.f32.mrf.mxu0  ;;  %2450 = vmatmul.mubr.bf16.vlgmr.msra.gmra.mxu1 %v873_v0 }
  0xf1   : > { %v817_v3 = vmax.f32 %v2376_v2, 0.0 }
  0xf2   : > { %v586_v4 = vpop.f32.mrf.mxu0 }
  0xf3   : > { %v815_v6 = vmax.f32 %v586_v4, 0.0  ;;  %v875_v10 = vpack.c.bf16 %v817_v3, %v816_v7 }
  0xf4   : > { %v2379_v8 = vpop.f32.mrf.mxu0 }
  0xf5   : > { %v874_v9 = vpack.c.bf16 %v815_v6, %v814_v5  ;;  %v820_v17 = vmax.f32 %v2379_v8, 0.0 }
  0xf6   : > { %v599_v11 = vpop.f32.mrf.mxu0 }
  0xf7   : > { %2453 = vmatprep.mubr.bf16.mxu1 %v874_v9  ;;  %v818_v15 = vmax.f32 %v599_v11, 0.0 }
  0xf8   : > { %v2380_v12 = vpop.f32.mrf.mxu0  ;;  %2454 = vmatmul.mubr.bf16.gmra.mxu1 %v875_v10 }
  0xf9   : > { %v821_v13 = vmax.f32 %v2380_v12, 0.0 }
  0xfa   : > { %v602_v14 = vpop.f32.mrf.mxu0 }
  0xfb   : > { %v819_v16 = vmax.f32 %v602_v14, 0.0  ;;  %v877_v20 = vpack.c.bf16 %v821_v13, %v820_v17 }
  0xfc   : > { %v2383_v18 = vpop.f32.mrf.mxu0 }
  0xfd   : > { %v876_v19 = vpack.c.bf16 %v819_v16, %v818_v15  ;;  %v824_v27 = vmax.f32 %v2383_v18, 0.0 }
  0xfe   : > { %v615_v21 = vpop.f32.mrf.mxu0 }
  0xff   : > { %2457 = vmatprep.mubr.bf16.mxu1 %v876_v19  ;;  %v822_v25 = vmax.f32 %v615_v21, 0.0 }
 0x100   : > { %v2384_v22 = vpop.f32.mrf.mxu0  ;;  %2458 = vmatmul.mubr.bf16.gmra.mxu1 %v877_v20 }
 0x101   : > { %v825_v23 = vmax.f32 %v2384_v22, 0.0 }
 0x102   : > { %v618_v24 = vpop.f32.mrf.mxu0 }
 0x103   : > { %v823_v26 = vmax.f32 %v618_v24, 0.0  ;;  %v879_v30 = vpack.c.bf16 %v825_v23, %v824_v27 }
 0x104   : > { %v2387_v28 = vpop.f32.mrf.mxu0 }
 0x105   : > { %v878_v29 = vpack.c.bf16 %v823_v26, %v822_v25  ;;  %v828_v37 = vmax.f32 %v2387_v28, 0.0 }
 0x106   : > { %v631_v31 = vpop.f32.mrf.mxu0 }
 0x107   : > { %2461 = vmatprep.mubr.bf16.mxu1 %v878_v29  ;;  %v826_v35 = vmax.f32 %v631_v31, 0.0 }
 0x108   : > { %v2388_v32 = vpop.f32.mrf.mxu0  ;;  %2462 = vmatmul.mubr.bf16.gmra.mxu1 %v879_v30 }
 0x109   : > { %v829_v33 = vmax.f32 %v2388_v32, 0.0 }
 0x10a   : > { %v634_v34 = vpop.f32.mrf.mxu0 }
 0x10b   : > { %v827_v36 = vmax.f32 %v634_v34, 0.0  ;;  %v881_v40 = vpack.c.bf16 %v829_v33, %v828_v37 }
 0x10c   : > { %v2391_v38 = vpop.f32.mrf.mxu0 }
 0x10d   : > { %v880_v39 = vpack.c.bf16 %v827_v36, %v826_v35  ;;  %v832_v47 = vmax.f32 %v2391_v38, 0.0 }
 0x10e   : > { %v647_v41 = vpop.f32.mrf.mxu0 }
 0x10f   : > { %2465 = vmatprep.mubr.bf16.mxu1 %v880_v39  ;;  %v830_v45 = vmax.f32 %v647_v41, 0.0 }
 0x110   : > { %v2392_v42 = vpop.f32.mrf.mxu0  ;;  %2466 = vmatmul.mubr.bf16.gmra.mxu1 %v881_v40 }
 0x111   : > { %v833_v43 = vmax.f32 %v2392_v42, 0.0 }
 0x112   : > { %v650_v44 = vpop.f32.mrf.mxu0 }
 0x113   : > { %v831_v46 = vmax.f32 %v650_v44, 0.0  ;;  %v883_v50 = vpack.c.bf16 %v833_v43, %v832_v47 }
 0x114   : > { %v2395_v48 = vpop.f32.mrf.mxu0 }
 0x115   : > { %v882_v49 = vpack.c.bf16 %v831_v46, %v830_v45  ;;  %v836_v57 = vmax.f32 %v2395_v48, 0.0 }
 0x116   : > { %v663_v51 = vpop.f32.mrf.mxu0 }
 0x117   : > { %2469 = vmatprep.mubr.bf16.mxu1 %v882_v49  ;;  %v834_v55 = vmax.f32 %v663_v51, 0.0 }
 0x118   : > { %v2396_v52 = vpop.f32.mrf.mxu0  ;;  %2470 = vmatmul.mubr.bf16.gmra.mxu1 %v883_v50 }
 0x119   : > { %v837_v53 = vmax.f32 %v2396_v52, 0.0 }
 0x11a   : > { %v666_v54 = vpop.f32.mrf.mxu0 }
 0x11b   : > { %v835_v56 = vmax.f32 %v666_v54, 0.0  ;;  %v885_v60 = vpack.c.bf16 %v837_v53, %v836_v57 }
 0x11c   : > { %v2399_v58 = vpop.f32.mrf.mxu0 }
 0x11d   : > { %v884_v59 = vpack.c.bf16 %v835_v56, %v834_v55  ;;  %v840_v3 = vmax.f32 %v2399_v58, 0.0 }
 0x11e   : > { %v679_v61 = vpop.f32.mrf.mxu0 }
 0x11f   : > { %2473 = vmatprep.mubr.bf16.mxu1 %v884_v59  ;;  %v838_v1 = vmax.f32 %v679_v61, 0.0 }
 0x120   : > { %v2400_v62 = vpop.f32.mrf.mxu0  ;;  %2474 = vmatmul.mubr.bf16.gmra.mxu1 %v885_v60 }
 0x121   : > { %v841_v63 = vmax.f32 %v2400_v62, 0.0 }
 0x122   : > { %v682_v0 = vpop.f32.mrf.mxu0 }
 0x123   : > { %v839_v2 = vmax.f32 %v682_v0, 0.0  ;;  %v887_v6 = vpack.c.bf16 %v841_v63, %v840_v3 }
 0x124   : > { %v2403_v4 = vpop.f32.mrf.mxu0 }
 0x125   : > { %v886_v5 = vpack.c.bf16 %v839_v2, %v838_v1  ;;  %v844_v13 = vmax.f32 %v2403_v4, 0.0 }
 0x126   : > { %v695_v7 = vpop.f32.mrf.mxu0 }
 0x127   : > { %2477 = vmatprep.mubr.bf16.mxu1 %v886_v5  ;;  %v842_v11 = vmax.f32 %v695_v7, 0.0 }
 0x128   : > { %v2404_v8 = vpop.f32.mrf.mxu0  ;;  %2478 = vmatmul.mubr.bf16.gmra.mxu1 %v887_v6 }
 0x129   : > { %v845_v9 = vmax.f32 %v2404_v8, 0.0 }
 0x12a   : > { %v698_v10 = vpop.f32.mrf.mxu0 }
 0x12b   : > { %v843_v12 = vmax.f32 %v698_v10, 0.0  ;;  %v889_v16 = vpack.c.bf16 %v845_v9, %v844_v13 }
 0x12c   : > { %v2407_v14 = vpop.f32.mrf.mxu0 }
 0x12d   : > { %v888_v15 = vpack.c.bf16 %v843_v12, %v842_v11  ;;  %v848_v23 = vmax.f32 %v2407_v14, 0.0 }
 0x12e   : > { %v711_v17 = vpop.f32.mrf.mxu0 }
 0x12f   : > { %2481 = vmatprep.mubr.bf16.mxu1 %v888_v15  ;;  %v846_v21 = vmax.f32 %v711_v17, 0.0 }
 0x130   : > { %v2408_v18 = vpop.f32.mrf.mxu0  ;;  %2482 = vmatmul.mubr.bf16.gmra.mxu1 %v889_v16 }
 0x131   : > { %v849_v19 = vmax.f32 %v2408_v18, 0.0 }
 0x132   : > { %v714_v20 = vpop.f32.mrf.mxu0 }
 0x133   : > { %v847_v22 = vmax.f32 %v714_v20, 0.0  ;;  %v891_v26 = vpack.c.bf16 %v849_v19, %v848_v23 }
 0x134   : > { %v2411_v24 = vpop.f32.mrf.mxu0 }
 0x135   : > { %v890_v25 = vpack.c.bf16 %v847_v22, %v846_v21  ;;  %v852_v33 = vmax.f32 %v2411_v24, 0.0 }
 0x136   : > { %v727_v27 = vpop.f32.mrf.mxu0 }
 0x137   : > { %2485 = vmatprep.mubr.bf16.mxu1 %v890_v25  ;;  %v850_v31 = vmax.f32 %v727_v27, 0.0 }
 0x138   : > { %v2412_v28 = vpop.f32.mrf.mxu0  ;;  %2486 = vmatmul.mubr.bf16.gmra.mxu1 %v891_v26 }
 0x139   : > { %v853_v29 = vmax.f32 %v2412_v28, 0.0 }
 0x13a   : > { %v730_v30 = vpop.f32.mrf.mxu0 }
 0x13b   : > { %v851_v32 = vmax.f32 %v730_v30, 0.0  ;;  %v893_v36 = vpack.c.bf16 %v853_v29, %v852_v33 }
 0x13c   : > { %v2415_v34 = vpop.f32.mrf.mxu0 }
 0x13d   : > { %v892_v35 = vpack.c.bf16 %v851_v32, %v850_v31  ;;  %v856_v43 = vmax.f32 %v2415_v34, 0.0 }
 0x13e   : > { %v743_v37 = vpop.f32.mrf.mxu0 }
 0x13f   : > { %2489 = vmatprep.mubr.bf16.mxu1 %v892_v35  ;;  %v854_v41 = vmax.f32 %v743_v37, 0.0 }
 0x140   : > { %v2416_v38 = vpop.f32.mrf.mxu0  ;;  %2490 = vmatmul.mubr.bf16.gmra.mxu1 %v893_v36 }
 0x141   : > { %v857_v39 = vmax.f32 %v2416_v38, 0.0 }
 0x142   : > { %v746_v40 = vpop.f32.mrf.mxu0 }
 0x143   : > { %v855_v42 = vmax.f32 %v746_v40, 0.0  ;;  %v895_v46 = vpack.c.bf16 %v857_v39, %v856_v43 }
 0x144   : > { %v2419_v44 = vpop.f32.mrf.mxu0 }
 0x145   : > { %v894_v45 = vpack.c.bf16 %v855_v42, %v854_v41  ;;  %v860_v53 = vmax.f32 %v2419_v44, 0.0 }
 0x146   : > { %v759_v47 = vpop.f32.mrf.mxu0 }
 0x147   : > { %2493 = vmatprep.mubr.bf16.mxu1 %v894_v45  ;;  %v858_v51 = vmax.f32 %v759_v47, 0.0 }
 0x148   : > { %v2420_v48 = vpop.f32.mrf.mxu0  ;;  %2494 = vmatmul.mubr.bf16.gmra.mxu1 %v895_v46 }
 0x149   : > { %v861_v49 = vmax.f32 %v2420_v48, 0.0 }
 0x14a   : > { %v762_v50 = vpop.f32.mrf.mxu0 }
 0x14b   : > { %v859_v52 = vmax.f32 %v762_v50, 0.0  ;;  %v897_v56 = vpack.c.bf16 %v861_v49, %v860_v53 }
 0x14c   : > { %v2423_v54 = vpop.f32.mrf.mxu0 }
 0x14d   : > { %v896_v55 = vpack.c.bf16 %v859_v52, %v858_v51  ;;  %v864_v63 = vmax.f32 %v2423_v54, 0.0  ;;  %v1239_v51 = vlaneseq }
 0x14e   : > { %v775_v57 = vpop.f32.mrf.mxu0 }
 0x14f   : > { %2497 = vmatprep.mubr.bf16.mxu1 %v896_v55  ;;  %v862_v61 = vmax.f32 %v775_v57, 0.0 }
 0x150   : > { %v2424_v58 = vpop.f32.mrf.mxu0  ;;  %2498 = vmatmul.mubr.bf16.gmra.mxu1 %v897_v56 }
 0x151   : > { %v865_v59 = vmax.f32 %v2424_v58, 0.0 }
 0x152   : > { %v778_v60 = vpop.f32.mrf.mxu0 }
 0x153   : > { %v863_v62 = vmax.f32 %v778_v60, 0.0  ;;  %v899_v2 = vpack.c.bf16 %v865_v59, %v864_v63 }
 0x154   : > { %v2427_v0 = vpop.f32.mrf.mxu0 }
 0x155   : > { %v898_v1 = vpack.c.bf16 %v863_v62, %v862_v61  ;;  %v868_v9 = vmax.f32 %v2427_v0, 0.0  ;;  %v3115_v61 = vand.u32 127, %v1239_v51 }
 0x156   : > { %v791_v3 = vpop.f32.mrf.mxu0 }
 0x157   : > { %2501 = vmatprep.mubr.bf16.mxu1 %v898_v1  ;;  %v866_v7 = vmax.f32 %v791_v3, 0.0  ;;  %vm1881_vm1 = vcmp.lt.s32.totalorder %v3115_v61, 64 }
 0x158   : > { %v2428_v4 = vpop.f32.mrf.mxu0  ;;  %2502 = vmatmul.mubr.bf16.gmra.mxu1 %v899_v2 }
 0x159   : > { %v869_v5 = vmax.f32 %v2428_v4, 0.0 }
 0x15a   : > { %v794_v6 = vpop.f32.mrf.mxu0 }
 0x15b   : > { %v867_v8 = vmax.f32 %v794_v6, 0.0  ;;  %v901_v11 = vpack.c.bf16 %v869_v5, %v868_v9 }
 0x15d   : > { %v900_v10 = vpack.c.bf16 %v867_v8, %v866_v7 }
 0x15f   : > { %2505 = vmatprep.mubr.bf16.mxu1 %v900_v10 }
 0x160   : > { %2506 = vmatmul.mubr.bf16.gmra.mxu1 %v901_v11 }
 0x1a8   : > { %v2447_v12 = vpop.f32.mrf.mxu0 }
 0x1a9   : > { %v2153_v13 = vmul.f32 -1.442695, %v2447_v12 }
 0x1aa   : > { %v984_v14 = vpop.f32.mrf.mxu0 }
 0x1ab   : > { %2577 = vpow2.f32 %v2153_v13  ;;  %v2151_v15 = vmul.f32 -1.442695, %v984_v14 }
 0x1ac   : > { %v2448_v16 = vpop.f32.mrf.mxu0 }
 0x1ad   : > { %2579 = vpow2.f32 %v2151_v15  ;;  %v2154_v17 = vmul.f32 -1.442695, %v2448_v16 }
 0x1ae   : > { %2581 = vtanh.f32 %v2447_v12  ;;  %v987_v18 = vpop.f32.mrf.mxu0 }
 0x1af   : > { %2583 = vpow2.f32 %v2154_v17  ;;  %v2152_v19 = vmul.f32 -1.442695, %v987_v18 }
 0x1b0   : > { %2585 = vtanh.f32 %v984_v14  ;;  %v2451_v20 = vpop.f32.mrf.mxu1 }
 0x1b1   : > { %2587 = vpow2.f32 %v2152_v19  ;;  %v2157_v21 = vmul.f32 -1.442695, %v2451_v20 }
 0x1b2   : > { %2589 = vtanh.f32 %v2448_v16  ;;  %v1000_v22 = vpop.f32.mrf.mxu1 }
 0x1b3   : > { %2591 = vpow2.f32 %v2157_v21  ;;  %v2155_v23 = vmul.f32 -1.442695, %v1000_v22 }
 0x1b4   : > { %2593 = vtanh.f32 %v987_v18  ;;  %v2452_v24 = vpop.f32.mrf.mxu1 }
 0x1b5   : > { %2595 = vpow2.f32 %v2155_v23  ;;  %v2158_v25 = vmul.f32 -1.442695, %v2452_v24 }
 0x1b6   : > { %2597 = vtanh.f32 %v2451_v20  ;;  %v1003_v26 = vpop.f32.mrf.mxu1 }
 0x1b7   : > { %2599 = vpow2.f32 %v2158_v25  ;;  %v2156_v27 = vmul.f32 -1.442695, %v1003_v26 }
 0x1b8   : > { %v2578_v28 = vpop.eup %2577  ;;  %2601 = vtanh.f32 %v1000_v22  ;;  %v2455_v29 = vpop.f32.mrf.mxu1 }
 0x1b9   : > { %v1435_v30 = vadd.f32 1.0, %v2578_v28  ;;  %2603 = vpow2.f32 %v2156_v27  ;;  %v2161_v31 = vmul.f32 -1.442695, %v2455_v29 }
 0x1ba   : > { %v2580_v32 = vpop.eup %2579  ;;  %2605 = vtanh.f32 %v2452_v24  ;;  %v1016_v33 = vpop.f32.mrf.mxu1 }
 0x1bb   : > { %v2582_v34 = vpop.eup %2581  ;;  %2607 = vrcp.f32 %v1435_v30  ;;  %v1433_v35 = vadd.f32 1.0, %v2580_v32  ;;  %v2159_v36 = vmul.f32 -1.442695, %v1016_v33 }
 0x1bc   : > { %v2584_v37 = vpop.eup %2583  ;;  %2609 = vpow2.f32 %v2161_v31  ;;  %v2456_v38 = vpop.f32.mrf.mxu1  ;;  %v1819_v12 = vmul.f32 1.1, %v2582_v34 }
 0x1bd   : > { %v2586_v39 = vpop.eup %2585  ;;  %2611 = vrcp.f32 %v1433_v35  ;;  %v1436_v40 = vadd.f32 1.0, %v2584_v37  ;;  %v2162_v42 = vmul.f32 -1.442695, %v2456_v38 }
 0x1be   : > { %v2588_v41 = vpop.eup %2587  ;;  %2613 = vpow2.f32 %v2159_v36  ;;  %v3100_v43 = vpop.f32.mrf.mxu1  ;;  %v1817_v15 = vmul.f32 1.1, %v2586_v39 }
 0x1bf   : > { %v2590_v44 = vpop.eup %2589  ;;  %2615 = vrcp.f32 %v1436_v40  ;;  %v1434_v45 = vadd.f32 1.0, %v2588_v41  ;;  %v2160_v52 = vmul.f32 -1.442695, %v3100_v43 }
 0x1c0   : > { %v2592_v46 = vpop.eup %2591  ;;  %2617 = vtanh.f32 %v1003_v26  ;;  %v3102_v47 = vpop.f32.mrf.mxu1  ;;  %v1820_v24 = vmul.f32 1.1, %v2590_v44 }
 0x1c1   : > { %v3104_v48 = vpop.eup %2593  ;;  %2619 = vrcp.f32 %v1434_v45  ;;  %v1439_v49 = vadd.f32 1.0, %v2592_v46  ;;  %v2165_v62 = vmul.f32 -1.442695, %v3102_v47 }
 0x1c2   : > { %v2596_v50 = vpop.eup %2595  ;;  %2621 = vpow2.f32 %v2162_v42  ;;  %v3107_v53 = vpop.f32.mrf.mxu1  ;;  %v1818_v32 = vmul.f32 1.1, %v3104_v48 }
 0x1c3   : > { %v3109_v54 = vpop.eup %2597  ;;  %2623 = vrcp.f32 %v1439_v49  ;;  %v1437_v55 = vadd.f32 1.0, %v2596_v50  ;;  %v2163_v6 = vmul.f32 -1.442695, %v3107_v53 }
 0x1c4   : > { %v2600_v56 = vpop.eup %2599  ;;  %2625 = vtanh.f32 %v2455_v29  ;;  %v3111_v57 = vpop.f32.mrf.mxu1  ;;  %v1823_v41 = vmul.f32 1.1, %v3109_v54 }
 0x1c5   : > { %v3113_v58 = vpop.eup %2601  ;;  %2627 = vrcp.f32 %v1437_v55  ;;  %v1440_v59 = vadd.f32 1.0, %v2600_v56  ;;  %v2166_v17 = vmul.f32 -1.442695, %v3111_v57 }
 0x1c6   : > { %v2604_v60 = vpop.eup %2603  ;;  %2629 = vpow2.f32 %v2160_v52  ;;  %v3118_v63 = vpop.f32.mrf.mxu1  ;;  %v1821_v49 = vmul.f32 1.1, %v3113_v58 }
 0x1c7   : > { %v3120_v0 = vpop.eup %2605  ;;  %2631 = vrcp.f32 %v1440_v59  ;;  %v1438_v1 = vadd.f32 1.0, %v2604_v60  ;;  %v2164_v25 = vmul.f32 -1.442695, %v3118_v63 }
 0x1c8   : > { %v2608_v2 = vpop.eup %2607  ;;  %2633 = vtanh.f32 %v1016_v33  ;;  %v3123_v3 = vpop.f32.mrf.mxu1 }
 0x1c9   : > { %v2610_v4 = vpop.eup %2609  ;;  %v1627_v5 = vmul.f32 1.002, %v2608_v2  ;;  %2635 = vrcp.f32 %v1438_v1  ;;  %v2169_v39 = vmul.f32 -1.442695, %v3123_v3 }
 0x1ca   : > { %v2612_v7 = vpop.eup %2611  ;;  %v1443_v8 = vadd.f32 1.0, %v2610_v4  ;;  %2637 = vpow2.f32 %v2165_v62  ;;  %v3127_v9 = vpop.f32.mrf.mxu1  ;;  %v1824_v62 = vmul.f32 1.1, %v3120_v0 }
 0x1cb   : > { %v2614_v10 = vpop.eup %2613  ;;  %v2217_v11 = vadd.f32 -0.001, %v1627_v5  ;;  %v1625_v13 = vmul.f32 1.002, %v2612_v7  ;;  %2639 = vtanh.f32 %v2456_v38  ;;  %v2167_v51 = vmul.f32 -1.442695, %v3127_v9 }
 0x1cc   : > { %v2616_v14 = vpop.eup %2615  ;;  %2641 = vrcp.f32 %v1443_v8  ;;  %v1441_v16 = vadd.f32 1.0, %v2614_v10  ;;  %v3135_v18 = vpop.f32.mrf.mxu1 }
 0x1cd   : > { %v3137_v19 = vpop.eup %2617  ;;  %v1884_v20 = vsel %vm1881_vm1, %v2217_v11, %v1819_v12  ;;  %v2215_v21 = vadd.f32 -0.001, %v1625_v13  ;;  %v1628_v22 = vmul.f32 1.002, %v2616_v14  ;;  %2643 = vpow2.f32 %v2163_v6 }
 0x1ce   : > { %v2620_v23 = vpop.eup %2619  ;;  %1948 = vst [vmem:[%s3132_s13 + $0x10] sm:$0xff] %v1884_v20  ;;  %2645 = vrcp.f32 %v1441_v16  ;;  %v3143_v26 = vpop.f32.mrf.mxu1  ;;  %v2170_v5 = vmul.f32 -1.442695, %v3135_v18  ;;  %v1822_v12 = vmul.f32 1.1, %v3137_v19 }
 0x1cf   : > { %v2622_v27 = vpop.eup %2621  ;;  %v1882_v28 = vsel %vm1881_vm1, %v2215_v21, %v1817_v15  ;;  %v2218_v29 = vadd.f32 -0.001, %v1628_v22  ;;  %v1626_v30 = vmul.f32 1.002, %v2620_v23  ;;  %2647 = vtanh.f32 %v3100_v43 }
 0x1d0   : > { %v2624_v31 = vpop.eup %2623  ;;  %1946 = vst [vmem:[%s3132_s13] sm:$0xff] %v1882_v28  ;;  %v1444_v33 = vadd.f32 1.0, %v2622_v27  ;;  %2649 = vpow2.f32 %v2166_v17  ;;  %v3150_v34 = vpop.f32.mrf.mxu1  ;;  %v2168_v15 = vmul.f32 -1.442695, %v3143_v26 }
 0x1d1   : > { %v2626_v35 = vpop.eup %2625  ;;  %v1885_v36 = vsel %vm1881_vm1, %v2218_v29, %v1820_v24  ;;  %v2216_v37 = vadd.f32 -0.001, %v1626_v30  ;;  %v1631_v38 = vmul.f32 1.002, %v2624_v31  ;;  %v2173_v28 = vmul.f32 -1.442695, %v3150_v34 }
 0x1d2   : > { %v2628_v40 = vpop.eup %2627  ;;  %1949 = vst [vmem:[%s3132_s13 + $0x18] sm:$0xff] %v1885_v36  ;;  %2651 = vrcp.f32 %v1444_v33  ;;  %v3157_v42 = vpop.f32.mrf.mxu1  ;;  %v1827_v23 = vmul.f32 1.1, %v2626_v35 }
 0x1d3   : > { %v2630_v43 = vpop.eup %2629  ;;  %v1883_v44 = vsel %vm1881_vm1, %v2216_v37, %v1818_v32  ;;  %v2221_v45 = vadd.f32 -0.001, %v1631_v38  ;;  %v1629_v46 = vmul.f32 1.002, %v2628_v40  ;;  %2653 = vpow2.f32 %v2164_v25 }
 0x1d4   : > { %v2632_v48 = vpop.eup %2631  ;;  %1947 = vst [vmem:[%s3132_s13 + $0x8] sm:$0xff] %v1883_v44  ;;  %v1442_v50 = vadd.f32 1.0, %v2630_v43  ;;  %2655 = vtanh.f32 %v3102_v47  ;;  %v3165_v52 = vpop.f32.mrf.mxu1  ;;  %v2171_v37 = vmul.f32 -1.442695, %v3157_v42 }
 0x1d5   : > { %v2634_v54 = vpop.eup %2633  ;;  %v1888_v55 = vsel %vm1881_vm1, %v2221_v45, %v1823_v41  ;;  %v2219_v56 = vadd.f32 -0.001, %v1629_v46  ;;  %v1632_v59 = vmul.f32 1.002, %v2632_v48  ;;  %2657 = vpow2.f32 %v2169_v39 }
 0x1d6   : > { %v2636_v60 = vpop.eup %2635  ;;  %1952 = vst [vmem:[%s3132_s13 + $0x30] sm:$0xff] %v1888_v55  ;;  %2659 = vrcp.f32 %v1442_v50  ;;  %v3171_v58 = vpop.f32.mrf.mxu1  ;;  %v1825_v27 = vmul.f32 1.1, %v2634_v54  ;;  %v2174_v48 = vmul.f32 -1.442695, %v3165_v52 }
 0x1d7   : > { %v2638_v47 = vpop.eup %2637  ;;  %v1886_v1 = vsel %vm1881_vm1, %v2219_v56, %v1821_v49  ;;  %v2222_v2 = vadd.f32 -0.001, %v1632_v59  ;;  %v1630_v4 = vmul.f32 1.002, %v2636_v60  ;;  %2661 = vpow2.f32 %v2167_v51 }
 0x1d8   : > { %v2640_v6 = vpop.eup %2639  ;;  %1950 = vst [vmem:[%s3132_s13 + $0x20] sm:$0xff] %v1886_v1  ;;  %v1447_v7 = vadd.f32 1.0, %v2638_v47  ;;  %v3177_v8 = vpop.f32.mrf.mxu1  ;;  %2663 = vtanh.f32 %v3107_v53  ;;  %v2172_v60 = vmul.f32 -1.442695, %v3171_v58 }
 0x1d9   : > { %v2642_v10 = vpop.eup %2641  ;;  %v1889_v0 = vsel %vm1881_vm1, %v2222_v2, %v1824_v62  ;;  %v2220_v11 = vadd.f32 -0.001, %v1630_v4  ;;  %v1828_v44 = vmul.f32 1.1, %v2640_v6 }
 0x1da   : > { %v2644_v13 = vpop.eup %2643  ;;  %1953 = vst [vmem:[%s3132_s13 + $0x38] sm:$0xff] %v1889_v0  ;;  %v1635_v14 = vmul.f32 1.002, %v2642_v10  ;;  %2665 = vrcp.f32 %v1447_v7  ;;  %v3185_v16 = vpop.f32.mrf.mxu1 }
 0x1db   : > { %v2646_v17 = vpop.eup %2645  ;;  %v1887_v20 = vsel %vm1881_vm1, %v2220_v11, %v1822_v12  ;;  %v1445_v21 = vadd.f32 1.0, %v2644_v13  ;;  %2667 = vpow2.f32 %v2170_v5 }
 0x1dc   : > { %v2648_v22 = vpop.eup %2647  ;;  %1951 = vst [vmem:[%s3132_s13 + $0x28] sm:$0xff] %v1887_v20  ;;  %v2225_v19 = vadd.f32 -0.001, %v1635_v14  ;;  %v1633_v53 = vmul.f32 1.002, %v2646_v17  ;;  %2669 = vtanh.f32 %v3111_v57  ;;  %v3191_v24 = vpop.f32.mrf.mxu1 }
 0x1dd   : > { %v2650_v25 = vpop.eup %2649  ;;  %2671 = vrcp.f32 %v1445_v21  ;;  %v1826_v55 = vmul.f32 1.1, %v2648_v22 }
 0x1de   : > { %v1892_v29 = vsel %vm1881_vm1, %v2225_v19, %v1827_v23  ;;  %v2223_v30 = vadd.f32 -0.001, %v1633_v53  ;;  %v1448_v31 = vadd.f32 1.0, %v2650_v25  ;;  %2673 = vpow2.f32 %v2168_v15  ;;  %v3196_v32 = vpop.f32.mrf.mxu1 }
 0x1df   : > { %v2652_v33 = vpop.eup %2651  ;;  %1956 = vst [vmem:[%s3132_s13 + $0x50] sm:$0xff] %v1892_v29  ;;  %2675 = vtanh.f32 %v3118_v63 }
 0x1e0   : > { %v2654_v57 = vpop.eup %2653  ;;  %v1890_v35 = vsel %vm1881_vm1, %v2223_v30, %v1825_v27  ;;  %v1636_v36 = vmul.f32 1.002, %v2652_v33  ;;  %2677 = vrcp.f32 %v1448_v31  ;;  %v3203_v38 = vpop.f32.mrf.mxu1  ;;  %v2178_v30 = vmul.f32 -1.442695, %v3191_v24 }
 0x1e1   : > { %v2656_v39 = vpop.eup %2655  ;;  %1954 = vst [vmem:[%s3132_s13 + $0x40] sm:$0xff] %v1890_v35  ;;  %v1446_v40 = vadd.f32 1.0, %v2654_v57  ;;  %2679 = vpow2.f32 %v2173_v28 }
 0x1e2   : > { %v2658_v41 = vpop.eup %2657  ;;  %v2226_v43 = vadd.f32 -0.001, %v1636_v36  ;;  %2681 = vtanh.f32 %v3123_v3  ;;  %v3207_v63 = vpop.f32.mrf.mxu1  ;;  %v1831_v11 = vmul.f32 1.1, %v2656_v39 }
 0x1e3   : > { %v2660_v45 = vpop.eup %2659  ;;  %2683 = vrcp.f32 %v1446_v40  ;;  %v1451_v46 = vadd.f32 1.0, %v2658_v41 }
 0x1e4   : > { %v1893_v49 = vsel %vm1881_vm1, %v2226_v43, %v1828_v44  ;;  %v1634_v50 = vmul.f32 1.002, %v2660_v45  ;;  %2685 = vpow2.f32 %v2171_v37  ;;  %v3212_v51 = vpop.f32.mrf.mxu1  ;;  %v2662_v54 = vpop.eup %2661 }
 0x1e5   : > { %1957 = vst [vmem:[%s3132_s13 + $0x58] sm:$0xff] %v1893_v49  ;;  %2687 = vrcp.f32 %v1451_v46  ;;  %v2664_v3 = vpop.eup %2663  ;;  %v1449_v59 = vadd.f32 1.0, %v2662_v54  ;;  %v2181_v54 = vmul.f32 -1.442695, %v3203_v38 }
 0x1e6   : > { %v2224_v56 = vadd.f32 -0.001, %v1634_v50  ;;  %2689 = vtanh.f32 %v3127_v9  ;;  %v3217_v62 = vpop.f32.mrf.mxu1  ;;  %v2177_v9 = vmul.f32 -1.442695, %v3177_v8  ;;  %v1829_v23 = vmul.f32 1.1, %v2664_v3 }
 0x1e7   : > { %v2666_v47 = vpop.eup %2665  ;;  %2691 = vpow2.f32 %v2174_v48 }
 0x1e8   : > { %v2668_v1 = vpop.eup %2667  ;;  %v1891_v2 = vsel %vm1881_vm1, %v2224_v56, %v1826_v55  ;;  %v1639_v4 = vmul.f32 1.002, %v2666_v47  ;;  %2693 = vrcp.f32 %v1449_v59  ;;  %v3221_v5 = vpop.f32.mrf.mxu1 }
 0x1e9   : > { %v2670_v6 = vpop.eup %2669  ;;  %1955 = vst [vmem:[%s3132_s13 + $0x48] sm:$0xff] %v1891_v2  ;;  %v1452_v7 = vadd.f32 1.0, %v2668_v1  ;;  %2695 = vtanh.f32 %v3135_v18  ;;  %v2175_v18 = vmul.f32 -1.442695, %v3185_v16 }
 0x1ea   : > { %v2672_v10 = vpop.eup %2671  ;;  %v2229_v0 = vadd.f32 -0.001, %v1639_v4  ;;  %2697 = vpow2.f32 %v2172_v60  ;;  %v3226_v12 = vpop.f32.mrf.mxu1  ;;  %v1832_v57 = vmul.f32 1.1, %v2670_v6  ;;  %v2179_v4 = vmul.f32 -1.442695, %v3207_v63 }
 0x1eb   : > { %v2674_v13 = vpop.eup %2673  ;;  %v1637_v14 = vmul.f32 1.002, %v2672_v10  ;;  %2699 = vrcp.f32 %v1452_v7 }
 0x1ec   : > { %v2676_v15 = vpop.eup %2675  ;;  %v1896_v17 = vsel %vm1881_vm1, %v2229_v0, %v1831_v11  ;;  %v1450_v20 = vadd.f32 1.0, %v2674_v13  ;;  %2701 = vtanh.f32 %v3143_v26  ;;  %v3232_v21 = vpop.f32.mrf.mxu1 }
 0x1ed   : > { %v2678_v22 = vpop.eup %2677  ;;  %1960 = vst [vmem:[%s3132_s13 + $0x70] sm:$0xff] %v1896_v17  ;;  %v2227_v19 = vadd.f32 -0.001, %v1637_v14  ;;  %2703 = vpow2.f32 %v2177_v9  ;;  %v1830_v46 = vmul.f32 1.1, %v2676_v15 }
 0x1ee   : > { %v2680_v53 = vpop.eup %2679  ;;  %v1640_v25 = vmul.f32 1.002, %v2678_v22  ;;  %2705 = vrcp.f32 %v1450_v20  ;;  %v3235_v27 = vpop.f32.mrf.mxu1  ;;  %v2182_v14 = vmul.f32 -1.442695, %v3212_v51 }
 0x1ef   : > { %v2682_v28 = vpop.eup %2681  ;;  %v1894_v29 = vsel %vm1881_vm1, %v2227_v19, %v1829_v23  ;;  %v1455_v26 = vadd.f32 1.0, %v2680_v53  ;;  %2707 = vtanh.f32 %v3150_v34  ;;  %v2176_v34 = vmul.f32 -1.442695, %v3196_v32 }
 0x1f0   : > { %v2684_v31 = vpop.eup %2683  ;;  %1958 = vst [vmem:[%s3132_s13 + $0x60] sm:$0xff] %v1894_v29  ;;  %v2230_v33 = vadd.f32 -0.001, %v1640_v25  ;;  %2709 = vpow2.f32 %v2175_v18  ;;  %v3242_v35 = vpop.f32.mrf.mxu1  ;;  %v1835_v50 = vmul.f32 1.1, %v2682_v28 }
 0x1f1   : > { %v2686_v36 = vpop.eup %2685  ;;  %v1638_v37 = vmul.f32 1.002, %v2684_v31  ;;  %2711 = vrcp.f32 %v1455_v26  ;;  %v2180_v25 = vmul.f32 -1.442695, %v3217_v62 }
 0x1f2   : > { %v2688_v39 = vpop.eup %2687  ;;  %v1897_v40 = vsel %vm1881_vm1, %v2230_v33, %v1832_v57  ;;  %v1453_v41 = vadd.f32 1.0, %v2686_v36  ;;  %2713 = vtanh.f32 %v3157_v42  ;;  %v3248_v43 = vpop.f32.mrf.mxu1 }
 0x1f3   : > { %v2690_v44 = vpop.eup %2689  ;;  %1961 = vst [vmem:[%s3132_s13 + $0x78] sm:$0xff] %v1897_v40  ;;  %v2228_v45 = vadd.f32 -0.001, %v1638_v37  ;;  %v1643_v48 = vmul.f32 1.002, %v2688_v39  ;;  %2715 = vpow2.f32 %v2178_v30 }
 0x1f4   : > { %v2692_v49 = vpop.eup %2691  ;;  %2717 = vrcp.f32 %v1453_v41  ;;  %v3256_v47 = vpop.f32.mrf.mxu1  ;;  %v1833_v9 = vmul.f32 1.1, %v2690_v44  ;;  %v2185_v37 = vmul.f32 -1.442695, %v3221_v5 }
 0x1f5   : > { %v2694_v55 = vpop.eup %2693  ;;  %v1895_v42 = vsel %vm1881_vm1, %v2228_v45, %v1830_v46  ;;  %v2233_v3 = vadd.f32 -0.001, %v1643_v48  ;;  %v1456_v56 = vadd.f32 1.0, %v2692_v49  ;;  %2719 = vtanh.f32 %v3165_v52 }
 0x1f6   : > { %v2696_v59 = vpop.eup %2695  ;;  %1959 = vst [vmem:[%s3132_s13 + $0x68] sm:$0xff] %v1895_v42  ;;  %v1641_v60 = vmul.f32 1.002, %v2694_v55  ;;  %2721 = vpow2.f32 %v2176_v34  ;;  %v3266_v15 = vpop.f32.mrf.mxu1  ;;  %v2183_v49 = vmul.f32 -1.442695, %v3226_v12 }
 0x1f7   : > { %v2698_v1 = vpop.eup %2697  ;;  %v1900_v2 = vsel %vm1881_vm1, %v2233_v3, %v1835_v50  ;;  %2723 = vrcp.f32 %v1456_v56  ;;  %v1836_v18 = vmul.f32 1.1, %v2696_v59 }
 0x1f8   : > { %v2700_v6 = vpop.eup %2699  ;;  %1964 = vst [vmem:[%s3132_s13 + $0x90] sm:$0xff] %v1900_v2  ;;  %v2231_v7 = vadd.f32 -0.001, %v1641_v60  ;;  %v1454_v10 = vadd.f32 1.0, %v2698_v1  ;;  %2725 = vtanh.f32 %v3171_v58  ;;  %v3275_v31 = vpop.f32.mrf.mxu1  ;;  %v2186_v60 = vmul.f32 -1.442695, %v3232_v21 }
 0x1f9   : > { %v2702_v52 = vpop.eup %2701  ;;  %v1644_v0 = vmul.f32 1.002, %v2700_v6  ;;  %2727 = vpow2.f32 %v2181_v54 }
 0x1fa   : > { %v2704_v11 = vpop.eup %2703  ;;  %v1898_v13 = vsel %vm1881_vm1, %v2231_v7, %v1833_v9  ;;  %2729 = vrcp.f32 %v1454_v10  ;;  %v1834_v26 = vmul.f32 1.1, %v2702_v52  ;;  %v3282_v45 = vpop.f32.mrf.mxu1 }
 0x1fb   : > { %v2706_v17 = vpop.eup %2705  ;;  %1962 = vst [vmem:[%s3132_s13 + $0x80] sm:$0xff] %v1898_v13  ;;  %v2234_v20 = vadd.f32 -0.001, %v1644_v0  ;;  %v1459_v22 = vadd.f32 1.0, %v2704_v11  ;;  %2731 = vtanh.f32 %v3177_v8  ;;  %v2184_v0 = vmul.f32 -1.442695, %v3235_v27 }
 0x1fc   : > { %v2708_v58 = vpop.eup %2707  ;;  %v1642_v19 = vmul.f32 1.002, %v2706_v17  ;;  %2733 = vpow2.f32 %v2179_v4  ;;  %v3292_v1 = vpop.f32.mrf.mxu1 }
 0x1fd   : > { %v2710_v23 = vpop.eup %2709  ;;  %v1901_v53 = vsel %vm1881_vm1, %v2234_v20, %v1836_v18  ;;  %2735 = vrcp.f32 %v1459_v22  ;;  %v1839_v41 = vmul.f32 1.1, %v2708_v58 }
 0x1fe   : > { %v2712_v28 = vpop.eup %2711  ;;  %1965 = vst [vmem:[%s3132_s13 + $0x98] sm:$0xff] %v1901_v53  ;;  %v2232_v29 = vadd.f32 -0.001, %v1642_v19  ;;  %v1457_v30 = vadd.f32 1.0, %v2710_v23  ;;  %2737 = vtanh.f32 %v3185_v16  ;;  %v3301_v20 = vpop.f32.mrf.mxu1  ;;  %v2189_v19 = vmul.f32 -1.442695, %v3242_v35 }
 0x1ff   : > { %v2714_v8 = vpop.eup %2713  ;;  %v1647_v33 = vmul.f32 1.002, %v2712_v28  ;;  %2739 = vpow2.f32 %v2182_v14 }
 0x200   : > { %v2716_v57 = vpop.eup %2715  ;;  %v1899_v36 = vsel %vm1881_vm1, %v2232_v29, %v1834_v26  ;;  %2741 = vrcp.f32 %v1457_v30  ;;  %v1837_v55 = vmul.f32 1.1, %v2714_v8  ;;  %v3308_v26 = vpop.f32.mrf.mxu1 }
 0x201   : > { %v2718_v39 = vpop.eup %2717  ;;  %1963 = vst [vmem:[%s3132_s13 + $0x88] sm:$0xff] %v1899_v36  ;;  %v2237_v40 = vadd.f32 -0.001, %v1647_v33  ;;  %v1460_v34 = vadd.f32 1.0, %v2716_v57  ;;  %2743 = vtanh.f32 %v3191_v24  ;;  %v2187_v33 = vmul.f32 -1.442695, %v3248_v43 }
 0x202   : > { %v2720_v16 = vpop.eup %2719  ;;  %v1645_v44 = vmul.f32 1.002, %v2718_v39  ;;  %2745 = vpow2.f32 %v2180_v25 }
 0x203   : > { %v2722_v46 = vpop.eup %2721  ;;  %v1904_v48 = vsel %vm1881_vm1, %v2237_v40, %v1839_v41  ;;  %2747 = vrcp.f32 %v1460_v34  ;;  %v1840_v6 = vmul.f32 1.1, %v2720_v16  ;;  %v2190_v16 = vmul.f32 -1.442695, %v3256_v47 }
 0x204   : > { %v2724_v50 = vpop.eup %2723  ;;  %1968 = vst [vmem:[%s3132_s13 + $0xb0] sm:$0xff] %v1904_v48  ;;  %v2235_v54 = vadd.f32 -0.001, %v1645_v44  ;;  %v1458_v42 = vadd.f32 1.0, %v2722_v46  ;;  %2749 = vtanh.f32 %v3196_v32  ;;  %v3318_v44 = vpop.f32.mrf.mxu1 }
 0x205   : > { %v2726_v24 = vpop.eup %2725  ;;  %v1648_v3 = vmul.f32 1.002, %v2724_v50  ;;  %2751 = vpow2.f32 %v2185_v37 }
 0x206   : > { %v2728_v56 = vpop.eup %2727  ;;  %v1902_v59 = vsel %vm1881_vm1, %v2235_v54, %v1837_v55  ;;  %2753 = vrcp.f32 %v1458_v42  ;;  %v1838_v14 = vmul.f32 1.1, %v2726_v24  ;;  %v2188_v24 = vmul.f32 -1.442695, %v3266_v15 }
 0x207   : > { %v2730_v2 = vpop.eup %2729  ;;  %1966 = vst [vmem:[%s3132_s13 + $0xa0] sm:$0xff] %v1902_v59  ;;  %v2238_v4 = vadd.f32 -0.001, %v1648_v3  ;;  %v1463_v7 = vadd.f32 1.0, %v2728_v56  ;;  %2755 = vtanh.f32 %v3203_v38 }
 0x208   : > { %v2732_v32 = vpop.eup %2731  ;;  %v1646_v9 = vmul.f32 1.002, %v2730_v2  ;;  %2757 = vpow2.f32 %v2183_v49  ;;  %v3327_v2 = vpop.f32.mrf.mxu1 }
 0x209   : > { %v2734_v10 = vpop.eup %2733  ;;  %v1905_v52 = vsel %vm1881_vm1, %v2238_v4, %v1840_v6  ;;  %2759 = vrcp.f32 %v1463_v7  ;;  %v1843_v25 = vmul.f32 1.1, %v2732_v32  ;;  %v2193_v32 = vmul.f32 -1.442695, %v3275_v31 }
 0x20a   : > { %v2736_v11 = vpop.eup %2735  ;;  %1969 = vst [vmem:[%s3132_s13 + $0xb8] sm:$0xff] %v1905_v52  ;;  %v2236_v13 = vadd.f32 -0.001, %v1646_v9  ;;  %v1461_v17 = vadd.f32 1.0, %v2734_v10  ;;  %2761 = vtanh.f32 %v3207_v63 }
 0x20b   : > { %v2738_v38 = vpop.eup %2737  ;;  %v1651_v18 = vmul.f32 1.002, %v2736_v11  ;;  %2763 = vpow2.f32 %v2186_v60 }
 0x20c   : > { %v2740_v22 = vpop.eup %2739  ;;  %v1903_v58 = vsel %vm1881_vm1, %v2236_v13, %v1838_v14  ;;  %2765 = vrcp.f32 %v1461_v17  ;;  %v1841_v37 = vmul.f32 1.1, %v2738_v38  ;;  %v3334_v13 = vpop.f32.mrf.mxu1  ;;  %v2191_v38 = vmul.f32 -1.442695, %v3282_v45 }
 0x20d   : > { %v2742_v23 = vpop.eup %2741  ;;  %1967 = vst [vmem:[%s3132_s13 + $0xa8] sm:$0xff] %v1903_v58  ;;  %v2241_v53 = vadd.f32 -0.001, %v1651_v18  ;;  %v1464_v28 = vadd.f32 1.0, %v2740_v22  ;;  %2767 = vtanh.f32 %v3212_v51 }
 0x20e   : > { %v2744_v63 = vpop.eup %2743  ;;  %v1649_v29 = vmul.f32 1.002, %v2742_v23  ;;  %2769 = vpow2.f32 %v2184_v0 }
 0x20f   : > { %v2746_v30 = vpop.eup %2745  ;;  %v1908_v8 = vsel %vm1881_vm1, %v2241_v53, %v1843_v25  ;;  %2771 = vrcp.f32 %v1464_v28  ;;  %v1844_v49 = vmul.f32 1.1, %v2744_v63  ;;  %v2194_v28 = vmul.f32 -1.442695, %v3292_v1  ;;  %v3344_v63 = vpop.f32.mrf.mxu1 }
 0x210   : > { %v2748_v57 = vpop.eup %2747  ;;  %1972 = vst [vmem:[%s3132_s13 + $0xd0] sm:$0xff] %v1908_v8  ;;  %v2239_v36 = vadd.f32 -0.001, %v1649_v29  ;;  %v1462_v39 = vadd.f32 1.0, %v2746_v30  ;;  %2773 = vtanh.f32 %v3217_v62 }
 0x211   : > { %v2750_v51 = vpop.eup %2749  ;;  %v1652_v40 = vmul.f32 1.002, %v2748_v57  ;;  %2775 = vpow2.f32 %v2189_v19 }
 0x212   : > { %v2752_v41 = vpop.eup %2751  ;;  %v1906_v34 = vsel %vm1881_vm1, %v2239_v36, %v1841_v37  ;;  %2777 = vrcp.f32 %v1462_v39  ;;  %v1842_v59 = vmul.f32 1.1, %v2750_v51  ;;  %v2192_v39 = vmul.f32 -1.442695, %v3301_v20 }
 0x213   : > { %v2754_v46 = vpop.eup %2753  ;;  %1970 = vst [vmem:[%s3132_s13 + $0xc0] sm:$0xff] %v1906_v34  ;;  %v2242_v48 = vadd.f32 -0.001, %v1652_v40  ;;  %v1467_v50 = vadd.f32 1.0, %v2752_v41  ;;  %2779 = vtanh.f32 %v3221_v5 }
 0x214   : > { %v2756_v62 = vpop.eup %2755  ;;  %v1650_v54 = vmul.f32 1.002, %v2754_v46  ;;  %2781 = vpow2.f32 %v2187_v33 }
 0x215   : > { %v2758_v55 = vpop.eup %2757  ;;  %v1909_v42 = vsel %vm1881_vm1, %v2242_v48, %v1844_v49  ;;  %2783 = vrcp.f32 %v1467_v50  ;;  %v1847_v52 = vmul.f32 1.1, %v2756_v62  ;;  %v2197_v50 = vmul.f32 -1.442695, %v3308_v26 }
 0x216   : > { %v2760_v3 = vpop.eup %2759  ;;  %1973 = vst [vmem:[%s3132_s13 + $0xd8] sm:$0xff] %v1909_v42  ;;  %v2240_v56 = vadd.f32 -0.001, %v1650_v54  ;;  %v1465_v60 = vadd.f32 1.0, %v2758_v55  ;;  %2785 = vtanh.f32 %v3226_v12 }
 0x217   : > { %v2762_v5 = vpop.eup %2761  ;;  %v1655_v4 = vmul.f32 1.002, %v2760_v3  ;;  %2787 = vpow2.f32 %v2190_v16  ;;  %v3353_v16 = vpop.f32.mrf.mxu1 }
 0x218   : > { %v2764_v6 = vpop.eup %2763  ;;  %v1907_v7 = vsel %vm1881_vm1, %v2240_v56, %v1842_v59  ;;  %2789 = vrcp.f32 %v1465_v60  ;;  %v1845_v58 = vmul.f32 1.1, %v2762_v5  ;;  %v2195_v60 = vmul.f32 -1.442695, %v3318_v44 }
 0x219   : > { %v2766_v9 = vpop.eup %2765  ;;  %1971 = vst [vmem:[%s3132_s13 + $0xc8] sm:$0xff] %v1907_v7  ;;  %v2245_v10 = vadd.f32 -0.001, %v1655_v4  ;;  %v1468_v0 = vadd.f32 1.0, %v2764_v6  ;;  %2791 = vtanh.f32 %v3232_v21  ;;  %v3360_v3 = vpop.f32.mrf.mxu1 }
 0x21a   : > { %v2768_v12 = vpop.eup %2767  ;;  %v1653_v11 = vmul.f32 1.002, %v2766_v9  ;;  %2793 = vpow2.f32 %v2188_v24 }
 0x21b   : > { %v2770_v14 = vpop.eup %2769  ;;  %v1912_v17 = vsel %vm1881_vm1, %v2245_v10, %v1847_v52  ;;  %2795 = vrcp.f32 %v1468_v0  ;;  %v1848_v8 = vmul.f32 1.1, %v2768_v12  ;;  %v2198_v52 = vmul.f32 -1.442695, %v3327_v2  ;;  %v3370_v0 = vpop.f32.mrf.mxu1 }
 0x21c   : > { %v2772_v18 = vpop.eup %2771  ;;  %1976 = vst [vmem:[%s3132_s13 + $0xf0] sm:$0xff] %v1912_v17  ;;  %v2243_v22 = vadd.f32 -0.001, %v1653_v11  ;;  %v1466_v19 = vadd.f32 1.0, %v2770_v14  ;;  %2797 = vtanh.f32 %v3235_v27 }
 0x21d   : > { %v2774_v21 = vpop.eup %2773  ;;  %v1656_v23 = vmul.f32 1.002, %v2772_v18  ;;  %2799 = vpow2.f32 %v2193_v32 }
 0x21e   : > { %v2776_v53 = vpop.eup %2775  ;;  %v1910_v25 = vsel %vm1881_vm1, %v2243_v22, %v1845_v58  ;;  %2801 = vrcp.f32 %v1466_v19  ;;  %v1846_v41 = vmul.f32 1.1, %v2774_v21  ;;  %v2196_v58 = vmul.f32 -1.442695, %v3334_v13 }
 0x21f   : > { %v2778_v29 = vpop.eup %2777  ;;  %1974 = vst [vmem:[%s3132_s13 + $0xe0] sm:$0xff] %v1910_v25  ;;  %v2246_v30 = vadd.f32 -0.001, %v1656_v23  ;;  %v1471_v33 = vadd.f32 1.0, %v2776_v53  ;;  %2803 = vtanh.f32 %v3242_v35  ;;  %v3379_v25 = vpop.f32.mrf.mxu1 }
 0x220   : > { %v2780_v27 = vpop.eup %2779  ;;  %v1654_v57 = vmul.f32 1.002, %v2778_v29  ;;  %2805 = vpow2.f32 %v2191_v38 }
 0x221   : > { %v2782_v36 = vpop.eup %2781  ;;  %v1913_v37 = vsel %vm1881_vm1, %v2246_v30, %v1848_v8  ;;  %2807 = vrcp.f32 %v1471_v33  ;;  %v1851_v55 = vmul.f32 1.1, %v2780_v27  ;;  %v2201_v8 = vmul.f32 -1.442695, %v3344_v63 }
 0x222   : > { %v2784_v51 = vpop.eup %2783  ;;  %1977 = vst [vmem:[%s3132_s13 + $0xf8] sm:$0xff] %v1913_v37  ;;  %v2244_v40 = vadd.f32 -0.001, %v1654_v57  ;;  %v1469_v34 = vadd.f32 1.0, %v2782_v36  ;;  %2809 = vtanh.f32 %v3248_v43 }
 0x223   : > { %v2786_v35 = vpop.eup %2785  ;;  %v1659_v46 = vmul.f32 1.002, %v2784_v51  ;;  %2811 = vpow2.f32 %v2194_v28 }
 0x224   : > { %v2788_v48 = vpop.eup %2787  ;;  %v1911_v49 = vsel %vm1881_vm1, %v2244_v40, %v1846_v41  ;;  %2813 = vrcp.f32 %v1469_v34  ;;  %v1849_v6 = vmul.f32 1.1, %v2786_v35  ;;  %v2199_v41 = vmul.f32 -1.442695, %v3353_v16 }
 0x225   : > { %v2790_v62 = vpop.eup %2789  ;;  %1975 = vst [vmem:[%s3132_s13 + $0xe8] sm:$0xff] %v1911_v49  ;;  %v2249_v54 = vadd.f32 -0.001, %v1659_v46  ;;  %v1472_v42 = vadd.f32 1.0, %v2788_v48  ;;  %2815 = vtanh.f32 %v3256_v47 }
 0x226   : > { %v2792_v43 = vpop.eup %2791  ;;  %v1657_v24 = vmul.f32 1.002, %v2790_v62  ;;  %2817 = vpow2.f32 %v2192_v39  ;;  %v3386_v39 = vpop.f32.mrf.mxu1 }
 0x227   : > { %v2794_v56 = vpop.eup %2793  ;;  %v1916_v59 = vsel %vm1881_vm1, %v2249_v54, %v1851_v55  ;;  %2819 = vrcp.f32 %v1472_v42  ;;  %v1852_v14 = vmul.f32 1.1, %v2792_v43  ;;  %v2202_v54 = vmul.f32 -1.442695, %v3360_v3 }
 0x228   : > { %v2796_v5 = vpop.eup %2795  ;;  %1980 = vst [vmem:[%s3132_s13 + $0x110] sm:$0xff] %v1916_v59  ;;  %v2247_v4 = vadd.f32 -0.001, %v1657_v24  ;;  %v1470_v7 = vadd.f32 1.0, %v2794_v56  ;;  %2821 = vtanh.f32 %v3266_v15  ;;  %v3396_v55 = vpop.f32.mrf.mxu1 }
 0x229   : > { %v2798_v47 = vpop.eup %2797  ;;  %v1660_v32 = vmul.f32 1.002, %v2796_v5  ;;  %2823 = vpow2.f32 %v2197_v50 }
 0x22a   : > { %v2800_v9 = vpop.eup %2799  ;;  %v1914_v10 = vsel %vm1881_vm1, %v2247_v4, %v1849_v6  ;;  %2825 = vrcp.f32 %v1470_v7  ;;  %v1850_v23 = vmul.f32 1.1, %v2798_v47  ;;  %v2200_v4 = vmul.f32 -1.442695, %v3370_v0 }
 0x22b   : > { %v2802_v12 = vpop.eup %2801  ;;  %1978 = vst [vmem:[%s3132_s13 + $0x100] sm:$0xff] %v1914_v10  ;;  %v2250_v11 = vadd.f32 -0.001, %v1660_v32  ;;  %v1475_v17 = vadd.f32 1.0, %v2800_v9  ;;  %2827 = vtanh.f32 %v3275_v31  ;;  %v3405_v9 = vpop.f32.mrf.mxu1 }
 0x22c   : > { %v2804_v15 = vpop.eup %2803  ;;  %v1658_v38 = vmul.f32 1.002, %v2802_v12  ;;  %2829 = vpow2.f32 %v2195_v60 }
 0x22d   : > { %v2806_v18 = vpop.eup %2805  ;;  %v1917_v22 = vsel %vm1881_vm1, %v2250_v11, %v1852_v14  ;;  %2831 = vrcp.f32 %v1475_v17  ;;  %v1855_v57 = vmul.f32 1.1, %v2804_v15  ;;  %v2205_v11 = vmul.f32 -1.442695, %v3379_v25 }
 0x22e   : > { %v2808_v19 = vpop.eup %2807  ;;  %1981 = vst [vmem:[%s3132_s13 + $0x118] sm:$0xff] %v1917_v22  ;;  %v2248_v21 = vadd.f32 -0.001, %v1658_v38  ;;  %v1473_v53 = vadd.f32 1.0, %v2806_v18  ;;  %2833 = vtanh.f32 %v3282_v45  ;;  %v3412_v22 = vpop.f32.mrf.mxu1 }
 0x22f   : > { %v2810_v31 = vpop.eup %2809  ;;  %v1663_v28 = vmul.f32 1.002, %v2808_v19  ;;  %2835 = vpow2.f32 %v2198_v52 }
 0x230   : > { %v2812_v29 = vpop.eup %2811  ;;  %v1915_v30 = vsel %vm1881_vm1, %v2248_v21, %v1850_v23  ;;  %2837 = vrcp.f32 %v1473_v53  ;;  %v1853_v46 = vmul.f32 1.1, %v2810_v31  ;;  %v2203_v21 = vmul.f32 -1.442695, %v3386_v39 }
 0x231   : > { %v2814_v33 = vpop.eup %2813  ;;  %1979 = vst [vmem:[%s3132_s13 + $0x108] sm:$0xff] %v1915_v30  ;;  %v2253_v27 = vadd.f32 -0.001, %v1663_v28  ;;  %v1476_v36 = vadd.f32 1.0, %v2812_v29  ;;  %2839 = vtanh.f32 %v3292_v1 }
 0x232   : > { %v2816_v45 = vpop.eup %2815  ;;  %v1661_v37 = vmul.f32 1.002, %v2814_v33  ;;  %2841 = vpow2.f32 %v2196_v58  ;;  %v2206_v33 = vmul.f32 -1.442695, %v3396_v55 }
 0x233   : > { %v2818_v51 = vpop.eup %2817  ;;  %v1920_v40 = vsel %vm1881_vm1, %v2253_v27, %v1855_v57  ;;  %2843 = vrcp.f32 %v1476_v36  ;;  %v1856_v24 = vmul.f32 1.1, %v2816_v45  ;;  %v3422_v27 = vpop.f32.mrf.mxu1 }
 0x234   : > { %v2820_v34 = vpop.eup %2819  ;;  %1984 = vst [vmem:[%s3132_s13 + $0x130] sm:$0xff] %v1920_v40  ;;  %v2251_v35 = vadd.f32 -0.001, %v1661_v37  ;;  %v1474_v48 = vadd.f32 1.0, %v2818_v51  ;;  %2845 = vtanh.f32 %v3301_v20 }
 0x235   : > { %v2822_v1 = vpop.eup %2821  ;;  %v1664_v49 = vmul.f32 1.002, %v2820_v34  ;;  %2847 = vpow2.f32 %v2201_v8  ;;  %v2204_v34 = vmul.f32 -1.442695, %v3405_v9 }
 0x236   : > { %v2824_v50 = vpop.eup %2823  ;;  %v1918_v62 = vsel %vm1881_vm1, %v2251_v35, %v1853_v46  ;;  %2849 = vrcp.f32 %v1474_v48  ;;  %v1854_v47 = vmul.f32 1.1, %v2822_v1 }
 0x237   : > { %v2826_v42 = vpop.eup %2825  ;;  %1982 = vst [vmem:[%s3132_s13 + $0x120] sm:$0xff] %v1918_v62  ;;  %v2254_v43 = vadd.f32 -0.001, %v1664_v49  ;;  %v1479_v56 = vadd.f32 1.0, %v2824_v50  ;;  %2851 = vtanh.f32 %v3308_v26  ;;  %v3431_v49 = vpop.f32.mrf.mxu1 }
 0x238   : > { %v2828_v20 = vpop.eup %2827  ;;  %v1662_v59 = vmul.f32 1.002, %v2826_v42  ;;  %2853 = vpow2.f32 %v2199_v41  ;;  %v2209_v42 = vmul.f32 -1.442695, %v3412_v22 }
 0x239   : > { %v2830_v60 = vpop.eup %2829  ;;  %v1921_v5 = vsel %vm1881_vm1, %v2254_v43, %v1856_v24  ;;  %2855 = vrcp.f32 %v1479_v56  ;;  %v1859_v15 = vmul.f32 1.1, %v2828_v20 }
 0x23a   : > { %v2832_v6 = vpop.eup %2831  ;;  %1985 = vst [vmem:[%s3132_s13 + $0x138] sm:$0xff] %v1921_v5  ;;  %v2252_v7 = vadd.f32 -0.001, %v1662_v59  ;;  %v1477_v32 = vadd.f32 1.0, %v2830_v60  ;;  %2857 = vtanh.f32 %v3318_v44  ;;  %v3438_v60 = vpop.f32.mrf.mxu1 }
 0x23b   : > { %v2834_v26 = vpop.eup %2833  ;;  %v1667_v10 = vmul.f32 1.002, %v2832_v6  ;;  %2859 = vpow2.f32 %v2202_v54  ;;  %v2207_v6 = vmul.f32 -1.442695, %v3422_v27 }
 0x23c   : > { %v2836_v52 = vpop.eup %2835  ;;  %v1919_v12 = vsel %vm1881_vm1, %v2252_v7, %v1854_v47  ;;  %2861 = vrcp.f32 %v1477_v32  ;;  %v1857_v31 = vmul.f32 1.1, %v2834_v26 }
 0x23d   : > { %v2838_v14 = vpop.eup %2837  ;;  %1983 = vst [vmem:[%s3132_s13 + $0x128] sm:$0xff] %v1919_v12  ;;  %v2257_v17 = vadd.f32 -0.001, %v1667_v10  ;;  %v1480_v38 = vadd.f32 1.0, %v2836_v52  ;;  %2863 = vtanh.f32 %v3327_v2 }
 0x23e   : > { %v2840_v44 = vpop.eup %2839  ;;  %v1665_v18 = vmul.f32 1.002, %v2838_v14  ;;  %2865 = vpow2.f32 %v2200_v4  ;;  %v3448_v14 = vpop.f32.mrf.mxu1 }
 0x23f   : > { %v2842_v58 = vpop.eup %2841  ;;  %v1924_v19 = vsel %vm1881_vm1, %v2257_v17, %v1859_v15  ;;  %2867 = vrcp.f32 %v1480_v38  ;;  %v1860_v45 = vmul.f32 1.1, %v2840_v44 }
 0x240   : > { %v2844_v23 = vpop.eup %2843  ;;  %1988 = vst [vmem:[%s3132_s13 + $0x150] sm:$0xff] %v1924_v19  ;;  %v2255_v53 = vadd.f32 -0.001, %v1665_v18  ;;  %v1478_v28 = vadd.f32 1.0, %v2842_v58  ;;  %2869 = vtanh.f32 %v3334_v13 }
 0x241   : > { %v2846_v2 = vpop.eup %2845  ;;  %v1668_v29 = vmul.f32 1.002, %v2844_v23  ;;  %2871 = vpow2.f32 %v2205_v11  ;;  %v2210_v11 = vmul.f32 -1.442695, %v3431_v49 }
 0x242   : > { %v2848_v30 = vpop.eup %2847  ;;  %v1922_v8 = vsel %vm1881_vm1, %v2255_v53, %v1857_v31  ;;  %2873 = vrcp.f32 %v1478_v28  ;;  %v1858_v48 = vmul.f32 1.1, %v2846_v2  ;;  %v3457_v2 = vpop.f32.mrf.mxu1 }
 0x243   : > { %v2850_v57 = vpop.eup %2849  ;;  %1986 = vst [vmem:[%s3132_s13 + $0x140] sm:$0xff] %v1922_v8  ;;  %v2258_v36 = vadd.f32 -0.001, %v1668_v29  ;;  %v1483_v37 = vadd.f32 1.0, %v2848_v30  ;;  %2875 = vtanh.f32 %v3344_v63 }
 0x244   : > { %v2852_v13 = vpop.eup %2851  ;;  %v1666_v51 = vmul.f32 1.002, %v2850_v57  ;;  %2877 = vpow2.f32 %v2203_v21  ;;  %v2208_v21 = vmul.f32 -1.442695, %v3438_v60 }
 0x245   : > { %v2854_v40 = vpop.eup %2853  ;;  %v1925_v41 = vsel %vm1881_vm1, %v2258_v36, %v1860_v45  ;;  %2879 = vrcp.f32 %v1483_v37  ;;  %v1863_v56 = vmul.f32 1.1, %v2852_v13 }
 0x246   : > { %v2856_v35 = vpop.eup %2855  ;;  %1989 = vst [vmem:[%s3132_s13 + $0x158] sm:$0xff] %v1925_v41  ;;  %v2256_v46 = vadd.f32 -0.001, %v1666_v51  ;;  %v1481_v1 = vadd.f32 1.0, %v2854_v40  ;;  %2881 = vtanh.f32 %v3353_v16  ;;  %v3464_v51 = vpop.f32.mrf.mxu1 }
 0x247   : > { %v2858_v63 = vpop.eup %2857  ;;  %v1671_v50 = vmul.f32 1.002, %v2856_v35  ;;  %2883 = vpow2.f32 %v2206_v33  ;;  %v2213_v33 = vmul.f32 -1.442695, %v3448_v14 }
 0x248   : > { %v2860_v62 = vpop.eup %2859  ;;  %v1923_v54 = vsel %vm1881_vm1, %v2256_v46, %v1858_v48  ;;  %2885 = vrcp.f32 %v1481_v1  ;;  %v1861_v32 = vmul.f32 1.1, %v2858_v63 }
 0x249   : > { %v2862_v43 = vpop.eup %2861  ;;  %1987 = vst [vmem:[%s3132_s13 + $0x148] sm:$0xff] %v1923_v54  ;;  %v2261_v24 = vadd.f32 -0.001, %v1671_v50  ;;  %v1484_v20 = vadd.f32 1.0, %v2860_v62  ;;  %2887 = vtanh.f32 %v3360_v3  ;;  %v2214_v54 = vmul.f32 -1.442695, %v3464_v51 }
 0x24a   : > { %v2864_v16 = vpop.eup %2863  ;;  %v1669_v59 = vmul.f32 1.002, %v2862_v43  ;;  %2889 = vpow2.f32 %v2204_v34  ;;  %v2211_v34 = vmul.f32 -1.442695, %v3457_v2 }
 0x24b   : > { %v2866_v5 = vpop.eup %2865  ;;  %v1928_v4 = vsel %vm1881_vm1, %v2261_v24, %v1863_v56  ;;  %2891 = vrcp.f32 %v1484_v20  ;;  %v1864_v38 = vmul.f32 1.1, %v2864_v16 }
 0x24c   : > { %v2868_v7 = vpop.eup %2867  ;;  %1992 = vst [vmem:[%s3132_s13 + $0x170] sm:$0xff] %v1928_v4  ;;  %v2259_v47 = vadd.f32 -0.001, %v1669_v59  ;;  %v1482_v26 = vadd.f32 1.0, %v2866_v5  ;;  %2893 = vtanh.f32 %v3370_v0 }
 0x24d   : > { %v2870_v3 = vpop.eup %2869  ;;  %v1672_v10 = vmul.f32 1.002, %v2868_v7  ;;  %2895 = vpow2.f32 %v2209_v42  ;;  %v3474_v42 = vpop.f32.mrf.mxu1 }
 0x24e   : > { %v2872_v52 = vpop.eup %2871  ;;  %v1926_v12 = vsel %vm1881_vm1, %v2259_v47, %v1861_v32  ;;  %2897 = vrcp.f32 %v1482_v26  ;;  %v1862_v31 = vmul.f32 1.1, %v2870_v3  ;;  %v2212_v4 = vmul.f32 -1.442695, %v3474_v42 }
 0x24f   : > { %v2874_v17 = vpop.eup %2873  ;;  %1990 = vst [vmem:[%s3132_s13 + $0x160] sm:$0xff] %v1926_v12  ;;  %v2262_v15 = vadd.f32 -0.001, %v1672_v10  ;;  %v1487_v44 = vadd.f32 1.0, %v2872_v52  ;;  %2899 = vtanh.f32 %v3379_v25 }
 0x250   : > { %v2876_v0 = vpop.eup %2875  ;;  %v1670_v18 = vmul.f32 1.002, %v2874_v17  ;;  %2901 = vpow2.f32 %v2207_v6 }
 0x251   : > { %v2878_v58 = vpop.eup %2877  ;;  %v1929_v19 = vsel %vm1881_vm1, %v2262_v15, %v1864_v38  ;;  %2903 = vrcp.f32 %v1487_v44  ;;  %v1867_v45 = vmul.f32 1.1, %v2876_v0 }
 0x252   : > { %v2880_v23 = vpop.eup %2879  ;;  %1993 = vst [vmem:[%s3132_s13 + $0x178] sm:$0xff] %v1929_v19  ;;  %v2260_v53 = vadd.f32 -0.001, %v1670_v18  ;;  %v1485_v28 = vadd.f32 1.0, %v2878_v58  ;;  %2905 = vtanh.f32 %v3386_v39 }
 0x253   : > { %v2882_v25 = vpop.eup %2881  ;;  %v1675_v29 = vmul.f32 1.002, %v2880_v23  ;;  %2907 = vpow2.f32 %v2210_v11 }
 0x254   : > { %v2884_v30 = vpop.eup %2883  ;;  %v1927_v8 = vsel %vm1881_vm1, %v2260_v53, %v1862_v31  ;;  %2909 = vrcp.f32 %v1485_v28  ;;  %v1865_v48 = vmul.f32 1.1, %v2882_v25 }
 0x255   : > { %v2886_v57 = vpop.eup %2885  ;;  %1991 = vst [vmem:[%s3132_s13 + $0x168] sm:$0xff] %v1927_v8  ;;  %v2265_v36 = vadd.f32 -0.001, %v1675_v29  ;;  %v1488_v37 = vadd.f32 1.0, %v2884_v30  ;;  %2911 = vtanh.f32 %v3396_v55 }
 0x256   : > { %v2888_v39 = vpop.eup %2887  ;;  %v1673_v13 = vmul.f32 1.002, %v2886_v57  ;;  %2913 = vpow2.f32 %v2208_v21 }
 0x257   : > { %v2890_v40 = vpop.eup %2889  ;;  %v1932_v41 = vsel %vm1881_vm1, %v2265_v36, %v1867_v45  ;;  %2915 = vrcp.f32 %v1488_v37  ;;  %v1868_v56 = vmul.f32 1.1, %v2888_v39 }
 0x258   : > { %v2892_v35 = vpop.eup %2891  ;;  %1996 = vst [vmem:[%s3132_s13 + $0x190] sm:$0xff] %v1932_v41  ;;  %v2263_v46 = vadd.f32 -0.001, %v1673_v13  ;;  %v1486_v1 = vadd.f32 1.0, %v2890_v40  ;;  %2917 = vtanh.f32 %v3405_v9 }
 0x259   : > { %v2894_v55 = vpop.eup %2893  ;;  %v1676_v63 = vmul.f32 1.002, %v2892_v35  ;;  %2919 = vpow2.f32 %v2213_v33 }
 0x25a   : > { %v2896_v50 = vpop.eup %2895  ;;  %v1930_v62 = vsel %vm1881_vm1, %v2263_v46, %v1865_v48  ;;  %2921 = vrcp.f32 %v1486_v1  ;;  %v1866_v47 = vmul.f32 1.1, %v2894_v55 }
 0x25b   : > { %v2898_v43 = vpop.eup %2897  ;;  %1994 = vst [vmem:[%s3132_s13 + $0x180] sm:$0xff] %v1930_v62  ;;  %v2266_v24 = vadd.f32 -0.001, %v1676_v63  ;;  %v1491_v20 = vadd.f32 1.0, %v2896_v50  ;;  %2923 = vtanh.f32 %v3412_v22 }
 0x25c   : > { %v2900_v9 = vpop.eup %2899  ;;  %v1674_v16 = vmul.f32 1.002, %v2898_v43  ;;  %2925 = vpow2.f32 %v2211_v34 }
 0x25d   : > { %v2902_v59 = vpop.eup %2901  ;;  %v1933_v5 = vsel %vm1881_vm1, %v2266_v24, %v1868_v56  ;;  %2927 = vrcp.f32 %v1491_v20  ;;  %v1871_v11 = vmul.f32 1.1, %v2900_v9 }
 0x25e   : > { %v2904_v6 = vpop.eup %2903  ;;  %1997 = vst [vmem:[%s3132_s13 + $0x198] sm:$0xff] %v1933_v5  ;;  %v2264_v7 = vadd.f32 -0.001, %v1674_v16  ;;  %v1489_v32 = vadd.f32 1.0, %v2902_v59  ;;  %2929 = vtanh.f32 %v3422_v27 }
 0x25f   : > { %v2906_v26 = vpop.eup %2905  ;;  %v1679_v22 = vmul.f32 1.002, %v2904_v6  ;;  %2931 = vpow2.f32 %v2214_v54 }
 0x260   : > { %v2908_v3 = vpop.eup %2907  ;;  %v1931_v10 = vsel %vm1881_vm1, %v2264_v7, %v1866_v47  ;;  %2933 = vrcp.f32 %v1489_v32  ;;  %v1869_v58 = vmul.f32 1.1, %v2906_v26 }
 0x261   : > { %v2910_v52 = vpop.eup %2909  ;;  %1995 = vst [vmem:[%s3132_s13 + $0x188] sm:$0xff] %v1931_v10  ;;  %v2269_v12 = vadd.f32 -0.001, %v1679_v22  ;;  %v1492_v17 = vadd.f32 1.0, %v2908_v3  ;;  %2935 = vtanh.f32 %v3431_v49 }
 0x262   : > { %v2912_v15 = vpop.eup %2911  ;;  %v1677_v38 = vmul.f32 1.002, %v2910_v52  ;;  %2937 = vpow2.f32 %v2212_v4 }
 0x263   : > { %v2914_v27 = vpop.eup %2913  ;;  %v1936_v44 = vsel %vm1881_vm1, %v2269_v12, %v1871_v11  ;;  %2939 = vrcp.f32 %v1492_v17  ;;  %v1872_v25 = vmul.f32 1.1, %v2912_v15 }
 0x264   : > { %v2916_v0 = vpop.eup %2915  ;;  %2000 = vst [vmem:[%s3132_s13 + $0x1b0] sm:$0xff] %v1936_v44  ;;  %v2267_v18 = vadd.f32 -0.001, %v1677_v38  ;;  %v1490_v19 = vadd.f32 1.0, %v2914_v27  ;;  %2941 = vtanh.f32 %v3438_v60 }
 0x265   : > { %v2918_v21 = vpop.eup %2917  ;;  %v1680_v23 = vmul.f32 1.002, %v2916_v0 }
 0x266   : > { %v2920_v49 = vpop.eup %2919  ;;  %v1934_v53 = vsel %vm1881_vm1, %v2267_v18, %v1869_v58  ;;  %2943 = vrcp.f32 %v1490_v19  ;;  %v1870_v45 = vmul.f32 1.1, %v2918_v21 }
 0x267   : > { %v2922_v31 = vpop.eup %2921  ;;  %1998 = vst [vmem:[%s3132_s13 + $0x1a0] sm:$0xff] %v1934_v53  ;;  %v2270_v28 = vadd.f32 -0.001, %v1680_v23  ;;  %v1495_v29 = vadd.f32 1.0, %v2920_v49  ;;  %2945 = vtanh.f32 %v3448_v14 }
 0x268   : > { %v2924_v30 = vpop.eup %2923  ;;  %v1678_v8 = vmul.f32 1.002, %v2922_v31 }
 0x269   : > { %v2926_v33 = vpop.eup %2925  ;;  %v1937_v60 = vsel %vm1881_vm1, %v2270_v28, %v1872_v25  ;;  %2947 = vrcp.f32 %v1495_v29  ;;  %v1875_v35 = vmul.f32 1.1, %v2924_v30 }
 0x26a   : > { %v2928_v57 = vpop.eup %2927  ;;  %2001 = vst [vmem:[%s3132_s13 + $0x1b8] sm:$0xff] %v1937_v60  ;;  %v2268_v36 = vadd.f32 -0.001, %v1678_v8  ;;  %v1493_v37 = vadd.f32 1.0, %v2926_v33  ;;  %2949 = vtanh.f32 %v3457_v2 }
 0x26b   : > { %v2930_v39 = vpop.eup %2929  ;;  %v1683_v13 = vmul.f32 1.002, %v2928_v57 }
 0x26c   : > { %v2932_v40 = vpop.eup %2931  ;;  %v1935_v14 = vsel %vm1881_vm1, %v2268_v36, %v1870_v45  ;;  %2951 = vrcp.f32 %v1493_v37  ;;  %v1873_v62 = vmul.f32 1.1, %v2930_v39 }
 0x26d   : > { %v2934_v41 = vpop.eup %2933  ;;  %1999 = vst [vmem:[%s3132_s13 + $0x1a8] sm:$0xff] %v1935_v14  ;;  %v2273_v34 = vadd.f32 -0.001, %v1683_v13  ;;  %v1496_v46 = vadd.f32 1.0, %v2932_v40  ;;  %2953 = vtanh.f32 %v3464_v51 }
 0x26e   : > { %v2936_v48 = vpop.eup %2935  ;;  %v1681_v1 = vmul.f32 1.002, %v2934_v41 }
 0x26f   : > { %v2938_v55 = vpop.eup %2937  ;;  %v1940_v2 = vsel %vm1881_vm1, %v2273_v34, %v1875_v35  ;;  %2955 = vrcp.f32 %v1496_v46  ;;  %v1876_v9 = vmul.f32 1.1, %v2936_v48 }
 0x270   : > { %v2940_v63 = vpop.eup %2939  ;;  %2004 = vst [vmem:[%s3132_s13 + $0x1d0] sm:$0xff] %v1940_v2  ;;  %v2271_v50 = vadd.f32 -0.001, %v1681_v1  ;;  %v1494_v54 = vadd.f32 1.0, %v2938_v55  ;;  %2957 = vtanh.f32 %v3474_v42 }
 0x271   : > { %v1684_v43 = vmul.f32 1.002, %v2940_v63  ;;  %v2942_v24 = vpop.eup %2941 }
 0x272   : > { %v1938_v56 = vsel %vm1881_vm1, %v2271_v50, %v1873_v62  ;;  %2959 = vrcp.f32 %v1494_v54  ;;  %v1874_v42 = vmul.f32 1.1, %v2942_v24 }
 0x273   : > { %v2944_v51 = vpop.eup %2943  ;;  %2002 = vst [vmem:[%s3132_s13 + $0x1c0] sm:$0xff] %v1938_v56  ;;  %v2274_v20 = vadd.f32 -0.001, %v1684_v43 }
 0x274   : > { %v1682_v16 = vmul.f32 1.002, %v2944_v51  ;;  %v2946_v59 = vpop.eup %2945 }
 0x275   : > { %v1941_v5 = vsel %vm1881_vm1, %v2274_v20, %v1876_v9  ;;  %v1879_v3 = vmul.f32 1.1, %v2946_v59 }
 0x276   : > { %v2948_v4 = vpop.eup %2947  ;;  %2005 = vst [vmem:[%s3132_s13 + $0x1d8] sm:$0xff] %v1941_v5  ;;  %v2272_v6 = vadd.f32 -0.001, %v1682_v16 }
 0x277   : > { %v1687_v7 = vmul.f32 1.002, %v2948_v4  ;;  %v2950_v47 = vpop.eup %2949 }
 0x278   : > { %v1939_v32 = vsel %vm1881_vm1, %v2272_v6, %v1874_v42  ;;  %v1877_v15 = vmul.f32 1.1, %v2950_v47 }
 0x279   : > { %v2952_v26 = vpop.eup %2951  ;;  %2003 = vst [vmem:[%s3132_s13 + $0x1c8] sm:$0xff] %v1939_v32  ;;  %v2277_v22 = vadd.f32 -0.001, %v1687_v7 }
 0x27a   : > { %v1685_v10 = vmul.f32 1.002, %v2952_v26  ;;  %v2954_v52 = vpop.eup %2953 }
 0x27b   : > { %v1944_v12 = vsel %vm1881_vm1, %v2277_v22, %v1879_v3  ;;  %v1880_v58 = vmul.f32 1.1, %v2954_v52 }
 0x27c   : > { %v2956_v11 = vpop.eup %2955  ;;  %2008 = vst [vmem:[%s3132_s13 + $0x1f0] sm:$0xff] %v1944_v12  ;;  %v2275_v17 = vadd.f32 -0.001, %v1685_v10 }
 0x27d   : > { %v1688_v38 = vmul.f32 1.002, %v2956_v11  ;;  %v2958_v27 = vpop.eup %2957 }
 0x27e   : > { %v1942_v44 = vsel %vm1881_vm1, %v2275_v17, %v1877_v15  ;;  %v1878_v49 = vmul.f32 1.1, %v2958_v27 }
 0x27f   : > { %v2960_v0 = vpop.eup %2959  ;;  %2006 = vst [vmem:[%s3132_s13 + $0x1e0] sm:$0xff] %v1942_v44  ;;  %v2278_v18 = vadd.f32 -0.001, %v1688_v38 }
 0x280   : > { %v1686_v19 = vmul.f32 1.002, %v2960_v0 }
 0x281   : > { %v1945_v21 = vsel %vm1881_vm1, %v2278_v18, %v1880_v58 }
 0x282   : > { %2009 = vst [vmem:[%s3132_s13 + $0x1f8] sm:$0xff] %v1945_v21  ;;  %v2276_v23 = vadd.f32 -0.001, %v1686_v19 }
 0x284   : > { %v1943_v53 = vsel %vm1881_vm1, %v2276_v23, %v1878_v49 }
 0x285   : > { %2007 = vst [vmem:[%s3132_s13 + $0x1e8] sm:$0xff] %v1943_v53 }
 0x286 PF: > { %s12_s9 = sadd.s32 1, %s2967_s9  }
 0x287   : > { %p9_p4 = scmp.ge.s32.totalorder %s12_s9, 4  }
 0x289   :  { %11 = sbr.rel (!%p9_p4) target bundleno = 1 (0x1), region = 58 }

</bundles_post_ra>
